<compile_context>
chip_gen: v7x
topology: tpu7x:2x2x1
jax: 0.10.0
libtpu: 0.0.40
codegen_flags: <defaults>
</compile_context>

<pallas_src>
import jax
import jax.numpy as jnp
from jax.experimental import pallas as pl
from jax.experimental.pallas import tpu as pltpu

LANE = 128
MIB = 1024 * 1024


# ----------------------------- Pallas kernel ------------------------------ #
def make_combined_kernel(tb, th, W, C_in, C_out_pad, inv_hw):
    P = th * W          # conv output positions per strip (per batch element)
    K = 9 * C_in        # folded 3x3 conv contraction width

    def kernel(x_ref, wconv_ref, bconv_ref, wfc_ref, bfc_ref, out_ref, acc_ref):
        # x_ref    : (tb, th+2, W+2, C_in)  bf16  padded-NHWC strip (incl. halo rows)
        # wconv_ref: (9*C_in, C_out_pad)    bf16  conv taps folded into contraction dim
        # bconv_ref: (1, C_out_pad)         f32
        # wfc_ref  : (C_out_pad, NC_pad)    bf16
        # bfc_ref  : (1, NC_pad)            f32
        # out_ref  : (1, tb, NC_pad)        f32
        # acc_ref  : (tb, C_out_pad)        f32   pooled-sum accumulator (scratch)
        s = pl.program_id(1)

        @pl.when(s == 0)
        def _init():
            acc_ref[...] = jnp.zeros_like(acc_ref)

        x = x_ref[...]                                        # load strip once

        # 3x3 SAME conv as ONE MXU matmul: in-VMEM im2col -> (tb*P, 9*C_in).
        cols = [x[:, kh:kh + th, kw:kw + W, :]                # (tb, th, W, C_in)
                for kh in range(3) for kw in range(3)]
        patch = jnp.concatenate(cols, axis=-1)                # (tb, th, W, 9*C_in)
        patch = patch.reshape(tb * P, K)
        conv = jnp.dot(patch, wconv_ref[...],
                       preferred_element_type=jnp.float32)    # (tb*P, C_out_pad)

        # Bias + ReLU in f32 on the VPU.
        h = jnp.maximum(conv + bconv_ref[...], 0.0)

        # Partial global average pool: per-batch sublane reduction (no matmul).
        h3 = h.reshape(tb, P, C_out_pad)
        strip_sum = jnp.concatenate(
            [jnp.sum(h3[i], axis=0, keepdims=True) for i in range(tb)], axis=0)
        acc_ref[...] += strip_sum                              # (tb, C_out_pad)

        @pl.when(s == pl.num_programs(1) - 1)
        def _finalize():
            feat = (acc_ref[...] * inv_hw).astype(jnp.bfloat16)       # (tb, C_out_pad)
            logits = jnp.dot(feat, wfc_ref[...],
                             preferred_element_type=jnp.float32) + bfc_ref[...]
            out_ref[...] = logits[None].astype(out_ref.dtype)         # (1, tb, NC_pad)

    return kernel


# ------------------------------ JAX wrapper -------------------------------- #
def combined_model_forward(x_nchw, w_conv, b_conv, w_fc, b_fc, tb=None, th=None):
    """x_nchw: [B, C_in, H, W] float32 (PyTorch layout). Returns [B, NC]."""
    B, C_in, H, W = x_nchw.shape
    C_out = w_conv.shape[0]
    NC = w_fc.shape[0]
    HW = H * W

    C_out_pad = pl.cdiv(C_out, LANE) * LANE
    NC_pad = pl.cdiv(NC, LANE) * LANE

    # --- per-generation budgets / core count ---
    kind = jax.devices()[0].device_kind.lower()
    multi_tc = ("v7" in kind) or ("7x" in kind)      # v7x: 2 TensorCores, 64 MiB VMEM
    vmem_budget = (48 if multi_tc else 96) * MIB

    # --- batch blocking: as large as possible; >=2 blocks only where it feeds
    #     a second TensorCore (v7x). ---
    if tb is None:
        tb = min(8, B)
        if multi_tc:
            while tb > 1 and pl.cdiv(B, tb) < 2:
                tb //= 2
    n_blocks = pl.cdiv(B, tb)
    B_pad = n_blocks * tb

    # --- H-strip size: largest divisor of H whose double-buffered x strip
    #     (C_in padded to a full 128-lane tile, bf16 sublane packing) fits. ---
    def strip_block_bytes(t):
        sub = pl.cdiv(W + 2, 16) * 16
        return tb * (t + 2) * sub * LANE * 2
    if th is None:
        th = 1
        for d in range(H, 0, -1):
            if H % d == 0 and 2 * strip_block_bytes(d) <= (vmem_budget * 6) // 10:
                th = d
                break
    assert H % th == 0, "strip height must divide H"
    n_strips = H // th

    # --- glue: NCHW -> NHWC, SAME spatial pad, batch pad, bf16, halo strips ---
    x_nhwc = jnp.transpose(x_nchw, (0, 2, 3, 1))
    x_pad = jnp.pad(
        x_nhwc, ((0, B_pad - B), (1, 1), (1, 1), (0, 0))
    ).astype(jnp.bfloat16)                                     # [B_pad, H+2, W+2, C_in]
    x_strips = jnp.stack(
        [x_pad[:, s * th:s * th + th + 2] for s in range(n_strips)], axis=1
    )                                                          # [B_pad, n_strips, th+2, W+2, C_in]

    # --- weights: taps folded into one (9*C_in, C_out_pad) bf16 matrix; FC in bf16 ---
    w_taps = jnp.transpose(w_conv, (2, 3, 1, 0)).reshape(9 * C_in, C_out)   # (kh,kw,ci)->co
    w_taps = jnp.pad(w_taps, ((0, 0), (0, C_out_pad - C_out))).astype(jnp.bfloat16)
    b_conv_row = jnp.pad(b_conv.reshape(1, C_out),
                         ((0, 0), (0, C_out_pad - C_out))).astype(jnp.float32)
    w_fc_mat = jnp.pad(w_fc.T, ((0, C_out_pad - C_out),
                                (0, NC_pad - NC))).astype(jnp.bfloat16)
    b_fc_row = jnp.pad(b_fc.reshape(1, NC), ((0, 0), (0, NC_pad - NC))).astype(jnp.float32)

    kernel = make_combined_kernel(tb, th, W, C_in, C_out_pad, 1.0 / HW)

    flops = (2 * B_pad * HW * 9 * C_in * C_out_pad      # conv matmul
             + 3 * B_pad * HW * C_out_pad               # bias + relu + pool adds
             + 2 * B_pad * C_out_pad * NC_pad)          # classifier
    bytes_accessed = (x_strips.size * 2 + w_taps.size * 2 + b_conv_row.size * 4
                      + w_fc_mat.size * 2 + b_fc_row.size * 4 + B_pad * NC_pad * 4)
    cost = pl.CostEstimate(flops=flops, transcendentals=0, bytes_accessed=bytes_accessed)

    weights_bytes = (w_taps.size * 2 + b_conv_row.size * 4
                     + w_fc_mat.size * 2 + b_fc_row.size * 4)
    patch_bytes = tb * th * W * 9 * C_in * 2
    est = (2 * strip_block_bytes(th) + weights_bytes + 4 * patch_bytes
           + tb * C_out_pad * 4 + 2 * tb * NC_pad * 4)
    vmem_limit = int(min(max(2 * est, 32 * MIB), vmem_budget))

    const = pl.Buffered(1)   # constant-index operands: no re-DMA -> single buffer
    out = pl.pallas_call(
        kernel,
        out_shape=jax.ShapeDtypeStruct((n_blocks, tb, NC_pad), jnp.float32),
        grid_spec=pltpu.PrefetchScalarGridSpec(
            num_scalar_prefetch=0,
            grid=(n_blocks, n_strips),
            in_specs=[
                pl.BlockSpec((tb, None, th + 2, W + 2, C_in),
                             lambda b, s: (b, s, 0, 0, 0)),
                pl.BlockSpec((9 * C_in, C_out_pad), lambda b, s: (0, 0),
                             pipeline_mode=const),
                pl.BlockSpec((1, C_out_pad), lambda b, s: (0, 0),
                             pipeline_mode=const),
                pl.BlockSpec((C_out_pad, NC_pad), lambda b, s: (0, 0),
                             pipeline_mode=const),
                pl.BlockSpec((1, NC_pad), lambda b, s: (0, 0),
                             pipeline_mode=const),
            ],
            out_specs=pl.BlockSpec((1, tb, NC_pad), lambda b, s: (b, 0, 0)),
            scratch_shapes=[pltpu.VMEM((tb, C_out_pad), jnp.float32)],
        ),
        compiler_params=pltpu.CompilerParams(
            dimension_semantics=("parallel", "arbitrary"),
            vmem_limit_bytes=vmem_limit,
        ),
        cost_estimate=cost,
    )(x_strips, w_taps, b_conv_row, w_fc_mat, b_fc_row)

    return out.reshape(B_pad, NC_pad)[:B, :NC]


# ------------------------- pure-JAX reference check ------------------------ #
def reference_forward(x_nchw, w_conv, b_conv, w_fc, b_fc):
    conv = jax.lax.conv_general_dilated(
        x_nchw, w_conv, window_strides=(1, 1), padding="SAME",
        dimension_numbers=("NCHW", "OIHW", "NCHW"),
    )
    act = jax.nn.relu(conv + b_conv[None, :, None, None])
    feat = jnp.mean(act, axis=(2, 3))                   # global avg pool + flatten
    return feat @ w_fc.T + b_fc[None, :]


if __name__ == "__main__":
    # Small, deterministic setup consistent with the module's forward.
    B, C_in, H, W = 2, 4, 16, 16
    C_out, NC = 32, 10

    key = jax.random.PRNGKey(0)
    k_x, k_wc, k_bc, k_wf, k_bf = jax.random.split(key, 5)

    x = jax.random.normal(k_x, (B, C_in, H, W), dtype=jnp.float32)
    # encoder params: Conv2d(C_in, C_out, 3, padding=1)
    w_conv = 0.1 * jax.random.normal(k_wc, (C_out, C_in, 3, 3), dtype=jnp.float32)
    b_conv = 0.1 * jax.random.normal(k_bc, (C_out,), dtype=jnp.float32)
    # eval_ params: Linear(C_out, NC)  (PyTorch layout: [out_features, in_features])
    w_fc = 0.1 * jax.random.normal(k_wf, (NC, C_out), dtype=jnp.float32)
    b_fc = 0.1 * jax.random.normal(k_bf, (NC,), dtype=jnp.float32)

    # th=8 -> 2 H-strips, exercising the strip accumulation path at small shapes.
    out = combined_model_forward(x, w_conv, b_conv, w_fc, b_fc, th=8)
    out = jax.block_until_ready(out)

    ref = reference_forward(x, w_conv, b_conv, w_fc, b_fc)
    assert out.shape == (B, NC)
    # bf16 conv/FC operands (f32 accumulation) -> slightly looser tolerance.
    assert jnp.allclose(out, ref, rtol=1e-2, atol=1e-2), (
        f"max abs err {jnp.max(jnp.abs(out - ref))}"
    )

    print("KERNEL_OK")
</pallas_src>

<mosaic_0001>
module attributes {stable_mosaic.version = 11 : i64} {
  func.func @kernel(%arg0: i32, %arg1: i32, %arg2: memref<2x1x10x18x4xbf16, #tpu.memory_space<vmem>>, %arg3: memref<36x128xbf16, #tpu.memory_space<vmem>>, %arg4: memref<1x128xf32, #tpu.memory_space<vmem>>, %arg5: memref<128x128xbf16, #tpu.memory_space<vmem>>, %arg6: memref<1x128xf32, #tpu.memory_space<vmem>>, %arg7: memref<1x2x128xf32, #tpu.memory_space<vmem>>, %arg8: memref<2x128xf32, #tpu.memory_space<vmem>>) attributes {dimension_semantics = [#tpu.dimension_semantics<parallel>, #tpu.dimension_semantics<arbitrary>], iteration_bounds = array<i64: 1, 2>, scalar_prefetch = 0 : i64, scratch_operands = 1 : i64, tpu.core_type = #tpu.core_type<tc>, window_params = [{transform_indices = @transform_0, window_bounds = array<i64: 2, 1, 10, 18, 4>}, {pipeline_mode = #tpu.pipeline_mode<synchronous>, transform_indices = @transform_1, window_bounds = array<i64: 36, 128>}, {pipeline_mode = #tpu.pipeline_mode<synchronous>, transform_indices = @transform_2, window_bounds = array<i64: 1, 128>}, {pipeline_mode = #tpu.pipeline_mode<synchronous>, transform_indices = @transform_3, window_bounds = array<i64: 128, 128>}, {pipeline_mode = #tpu.pipeline_mode<synchronous>, transform_indices = @transform_4, window_bounds = array<i64: 1, 128>}, {transform_indices = @transform_5, window_bounds = array<i64: 1, 2, 128>}]} {
    %c0_i32 = arith.constant 0 : i32
    %0 = arith.cmpi eq, %arg1, %c0_i32 : i32
    %1 = arith.extui %0 : i1 to i32
    %c0_i32_0 = arith.constant 0 : i32
    %2 = arith.cmpi ne, %1, %c0_i32_0 : i32
    scf.if %2 {
      %cst_17 = arith.constant 0.000000e+00 : f32
      %39 = vector.broadcast %cst_17 : f32 to vector<2x128xf32>
      %c0_18 = arith.constant 0 : index
      %c0_19 = arith.constant 0 : index
      %40 = vector.load %arg8[%c0_18, %c0_19] : memref<2x128xf32, #tpu.memory_space<vmem>>, vector<2x128xf32>
      tpu.vector_store %arg8[%c0_18, %c0_19], %39 {strides = array<i32>} : memref<2x128xf32, #tpu.memory_space<vmem>>, vector<2x128xf32>,
    } else {
    }
    %c0 = arith.constant 0 : index
    %c0_1 = arith.constant 0 : index
    %c0_2 = arith.constant 0 : index
    %c0_3 = arith.constant 0 : index
    %c0_4 = arith.constant 0 : index
    %3 = vector.load %arg2[%c0, %c0_1, %c0_2, %c0_3, %c0_4] : memref<2x1x10x18x4xbf16, #tpu.memory_space<vmem>>, vector<2x1x10x18x4xbf16>
    %4 = vector.shape_cast %3 : vector<2x1x10x18x4xbf16> to vector<2x10x18x4xbf16>
    %5 = vector.extract_strided_slice %4 {offsets = [0, 0, 0, 0], sizes = [2, 8, 16, 4], strides = [1, 1, 1, 1]} : vector<2x10x18x4xbf16> to vector<2x8x16x4xbf16>
    %6 = vector.extract_strided_slice %4 {offsets = [0, 0, 1, 0], sizes = [2, 8, 16, 4], strides = [1, 1, 1, 1]} : vector<2x10x18x4xbf16> to vector<2x8x16x4xbf16>
    %7 = vector.extract_strided_slice %4 {offsets = [0, 0, 2, 0], sizes = [2, 8, 16, 4], strides = [1, 1, 1, 1]} : vector<2x10x18x4xbf16> to vector<2x8x16x4xbf16>
    %8 = vector.extract_strided_slice %4 {offsets = [0, 1, 0, 0], sizes = [2, 8, 16, 4], strides = [1, 1, 1, 1]} : vector<2x10x18x4xbf16> to vector<2x8x16x4xbf16>
    %9 = vector.extract_strided_slice %4 {offsets = [0, 1, 1, 0], sizes = [2, 8, 16, 4], strides = [1, 1, 1, 1]} : vector<2x10x18x4xbf16> to vector<2x8x16x4xbf16>
    %10 = vector.extract_strided_slice %4 {offsets = [0, 1, 2, 0], sizes = [2, 8, 16, 4], strides = [1, 1, 1, 1]} : vector<2x10x18x4xbf16> to vector<2x8x16x4xbf16>
    %11 = vector.extract_strided_slice %4 {offsets = [0, 2, 0, 0], sizes = [2, 8, 16, 4], strides = [1, 1, 1, 1]} : vector<2x10x18x4xbf16> to vector<2x8x16x4xbf16>
    %12 = vector.extract_strided_slice %4 {offsets = [0, 2, 1, 0], sizes = [2, 8, 16, 4], strides = [1, 1, 1, 1]} : vector<2x10x18x4xbf16> to vector<2x8x16x4xbf16>
    %13 = vector.extract_strided_slice %4 {offsets = [0, 2, 2, 0], sizes = [2, 8, 16, 4], strides = [1, 1, 1, 1]} : vector<2x10x18x4xbf16> to vector<2x8x16x4xbf16>
    %14 = tpu.concatenate %5, %6, %7, %8, %9, %10, %11, %12, %13 in 3 : vector<2x8x16x4xbf16>, vector<2x8x16x4xbf16>, vector<2x8x16x4xbf16>, vector<2x8x16x4xbf16>, vector<2x8x16x4xbf16>, vector<2x8x16x4xbf16>, vector<2x8x16x4xbf16>, vector<2x8x16x4xbf16>, vector<2x8x16x4xbf16> -> vector<2x8x16x36xbf16>
    %15 = vector.shape_cast %14 : vector<2x8x16x36xbf16> to vector<256x36xbf16>
    %c0_5 = arith.constant 0 : index
    %c0_6 = arith.constant 0 : index
    %16 = vector.load %arg3[%c0_5, %c0_6] : memref<36x128xbf16, #tpu.memory_space<vmem>>, vector<36x128xbf16>
    %cst = arith.constant dense<0.000000e+00> : vector<256x128xf32>
    %17 = tpu.matmul %15, %16, %cst {dimension_numbers = #tpu.dot_dimension_numbers<[1], [0], [0], [1], [0, 0, 1, 1], [], []>} : vector<256x36xbf16>, vector<36x128xbf16>, vector<256x128xf32> -> vector<256x128xf32>
    %c0_7 = arith.constant 0 : index
    %c0_8 = arith.constant 0 : index
    %18 = vector.load %arg4[%c0_7, %c0_8] : memref<1x128xf32, #tpu.memory_space<vmem>>, vector<1x128xf32>
    %19 = vector.broadcast %18 : vector<1x128xf32> to vector<256x128xf32>
    %20 = arith.addf %17, %19 : vector<256x128xf32>
    %cst_9 = arith.constant 0.000000e+00 : f32
    %21 = vector.broadcast %cst_9 : f32 to vector<256x128xf32>
    %22 = arith.maximumf %20, %21 : vector<256x128xf32>
    %23 = vector.shape_cast %22 : vector<256x128xf32> to vector<2x128x128xf32>
    %24 = vector.extract_strided_slice %23 {offsets = [0, 0, 0], sizes = [1, 128, 128], strides = [1, 1, 1]} : vector<2x128x128xf32> to vector<1x128x128xf32>
    %25 = vector.shape_cast %24 : vector<1x128x128xf32> to vector<128x128xf32>
    %cst_10 = arith.constant dense<0.000000e+00> : vector<128xf32>
    %26 = vector.multi_reduction <add>, %25, %cst_10 [0] : vector<128x128xf32> to vector<128xf32>
    %27 = vector.shape_cast %26 : vector<128xf32> to vector<1x128xf32>
    %28 = vector.extract_strided_slice %23 {offsets = [1, 0, 0], sizes = [1, 128, 128], strides = [1, 1, 1]} : vector<2x128x128xf32> to vector<1x128x128xf32>
    %29 = vector.shape_cast %28 : vector<1x128x128xf32> to vector<128x128xf32>
    %cst_11 = arith.constant dense<0.000000e+00> : vector<128xf32>
    %30 = vector.multi_reduction <add>, %29, %cst_11 [0] : vector<128x128xf32> to vector<128xf32>
    %31 = vector.shape_cast %30 : vector<128xf32> to vector<1x128xf32>
    %32 = tpu.concatenate %27, %31 in 0 : vector<1x128xf32>, vector<1x128xf32> -> vector<2x128xf32>
    %c0_12 = arith.constant 0 : index
    %c0_13 = arith.constant 0 : index
    %33 = vector.load %arg8[%c0_12, %c0_13] : memref<2x128xf32, #tpu.memory_space<vmem>>, vector<2x128xf32>
    %34 = arith.addf %33, %32 : vector<2x128xf32>
    %c0_14 = arith.constant 0 : index
    %c0_15 = arith.constant 0 : index
    %35 = vector.load %arg8[%c0_14, %c0_15] : memref<2x128xf32, #tpu.memory_space<vmem>>, vector<2x128xf32>
    tpu.vector_store %arg8[%c0_14, %c0_15], %34 {strides = array<i32>} : memref<2x128xf32, #tpu.memory_space<vmem>>, vector<2x128xf32>,
    %c1_i32 = arith.constant 1 : i32
    %36 = arith.cmpi eq, %arg1, %c1_i32 : i32
    %37 = arith.extui %36 : i1 to i32
    %c0_i32_16 = arith.constant 0 : i32
    %38 = arith.cmpi ne, %37, %c0_i32_16 : i32
    scf.if %38 {
      %c0_17 = arith.constant 0 : index
      %c0_18 = arith.constant 0 : index
      %39 = vector.load %arg8[%c0_17, %c0_18] : memref<2x128xf32, #tpu.memory_space<vmem>>, vector<2x128xf32>
      %cst_19 = arith.constant 3.906250e-03 : f32
      %40 = vector.broadcast %cst_19 : f32 to vector<2x128xf32>
      %41 = arith.mulf %39, %40 : vector<2x128xf32>
      %42 = arith.truncf %41 : vector<2x128xf32> to vector<2x128xbf16>
      %c0_20 = arith.constant 0 : index
      %c0_21 = arith.constant 0 : index
      %43 = vector.load %arg5[%c0_20, %c0_21] : memref<128x128xbf16, #tpu.memory_space<vmem>>, vector<128x128xbf16>
      %cst_22 = arith.constant dense<0.000000e+00> : vector<2x128xf32>
      %44 = tpu.matmul %42, %43, %cst_22 {dimension_numbers = #tpu.dot_dimension_numbers<[1], [0], [0], [1], [0, 0, 1, 1], [], []>} : vector<2x128xbf16>, vector<128x128xbf16>, vector<2x128xf32> -> vector<2x128xf32>
      %c0_23 = arith.constant 0 : index
      %c0_24 = arith.constant 0 : index
      %45 = vector.load %arg6[%c0_23, %c0_24] : memref<1x128xf32, #tpu.memory_space<vmem>>, vector<1x128xf32>
      %46 = vector.broadcast %45 : vector<1x128xf32> to vector<2x128xf32>
      %47 = arith.addf %44, %46 : vector<2x128xf32>
      %48 = vector.shape_cast %47 : vector<2x128xf32> to vector<1x2x128xf32>
      %c0_25 = arith.constant 0 : index
      %c0_26 = arith.constant 0 : index
      %c0_27 = arith.constant 0 : index
      %49 = vector.load %arg7[%c0_25, %c0_26, %c0_27] : memref<1x2x128xf32, #tpu.memory_space<vmem>>, vector<1x2x128xf32>
      tpu.vector_store %arg7[%c0_25, %c0_26, %c0_27], %48 {strides = array<i32>} : memref<1x2x128xf32, #tpu.memory_space<vmem>>, vector<1x2x128xf32>,
    } else {
    }
    return
  }
  func.func @transform_0(%arg0: i32, %arg1: i32) -> (i32, i32, i32, i32, i32) {
    %c0_i32 = arith.constant 0 : i32
    %c0_i32_0 = arith.constant 0 : i32
    %c0_i32_1 = arith.constant 0 : i32
    %c0_i32_2 = arith.constant 0 : i32
    return %arg0, %arg1, %c0_i32, %c0_i32_0, %c0_i32_1 : i32, i32, i32, i32, i32
  }
  func.func @transform_1(%arg0: i32, %arg1: i32) -> (i32, i32) {
    %c0_i32 = arith.constant 0 : i32
    %c0_i32_0 = arith.constant 0 : i32
    %c0_i32_1 = arith.constant 0 : i32
    return %c0_i32, %c0_i32_0 : i32, i32
  }
  func.func @transform_2(%arg0: i32, %arg1: i32) -> (i32, i32) {
    %c0_i32 = arith.constant 0 : i32
    %c0_i32_0 = arith.constant 0 : i32
    %c0_i32_1 = arith.constant 0 : i32
    return %c0_i32, %c0_i32_0 : i32, i32
  }
  func.func @transform_3(%arg0: i32, %arg1: i32) -> (i32, i32) {
    %c0_i32 = arith.constant 0 : i32
    %c0_i32_0 = arith.constant 0 : i32
    %c0_i32_1 = arith.constant 0 : i32
    return %c0_i32, %c0_i32_0 : i32, i32
  }
  func.func @transform_4(%arg0: i32, %arg1: i32) -> (i32, i32) {
    %c0_i32 = arith.constant 0 : i32
    %c0_i32_0 = arith.constant 0 : i32
    %c0_i32_1 = arith.constant 0 : i32
    return %c0_i32, %c0_i32_0 : i32, i32
  }
  func.func @transform_5(%arg0: i32, %arg1: i32) -> (i32, i32, i32) {
    %c0_i32 = arith.constant 0 : i32
    %c0_i32_0 = arith.constant 0 : i32
    %c0_i32_1 = arith.constant 0 : i32
    return %arg0, %c0_i32, %c0_i32_0 : i32, i32, i32
  }
}

</mosaic_0001>

<bundles_post_ra>
// kernel: tpu_custom_call.1
= control target key start
LH: loop header
LB: loop body
LE: loop exit
PB: predicated region body
PF: predicated region fallthrough
CT: control target
= control target key end

     0   :  { %10 = vsyncpa [#allocation5], 0  ;;  %s2449_s18 = smov 0   ;;  %s2451_s19 = smov 0   ;;  %s3372_s0 = inlined_call_operand.vmem [shape: bf16[2,2,10,18,4], index: 0, kind: input, shape index: {}]   ;;  %s3373_s1 = inlined_call_operand.vmem [shape: bf16[36,128], index: 1, kind: input, shape index: {}]   ;;  %s3374_s2 = inlined_call_operand.vmem [shape: f32[1,128], index: 2, kind: input, shape index: {}]   ;;  %s3375_s3 = inlined_call_operand.vmem [shape: bf16[128,128], index: 3, kind: input, shape index: {}]   ;;  %s3376_s4 = inlined_call_operand.vmem [shape: f32[1,128], index: 4, kind: input, shape index: {}]   ;;  %s3377_s5 = inlined_call_operand.hbm [shape: f32[1,2,128], index: 5, kind: output, shape index: {}]  }
   0x1   :  { %s2453_s20 = smov 0   ;;  %s2455_s21 = smov 0  }
   0x2   :  { %s2457_s22 = smov 0  }
   0x3 LB: > { %s2051_s23 = sadd.s32 4294967295, %s2405_s22   ;;  %s25_s24 = sadd.s32 1, %s2401_s21  ;;  %s2405_s22 = sphi %s2457_s22, %s16_s22   ;;  %s2401_s21 = sphi %s2455_s21, %s3382_s21   ;;  %s2397_s20 = sphi %s2453_s20, %s3381_s20   ;;  %s2393_s19 = sphi %s2451_s19, %s3380_s19   ;;  %s2389_s18 = sphi %s2449_s18, %s3379_s18  }
   0x4   : > { %p26_p0 = scmp.ge.s32.totalorder %s25_s24, 2  ;;  %p44_p1 = scmp.ne.s32.totalorder %s2393_s19, %s2389_s18 }
   0x5   : > { %p45_p2 = scmp.eq.s32.totalorder %s2405_s22, 0  ;;  %s37_s26 = sadd.s32 1, %s2393_s19 }
   0x6   : > { %s3384_s24 = smov (%p26_p0, %s25_s24), 0  ;;  %p2053_p5 = scmp.ge.s32.totalorder %s2405_s22, 2 }
   0x7   : > { %p46_p3 = por %p45_p2, %p44_p1  ;;  %s33_s25 = ssub.s32 %s2401_s21, %s3384_s24 }
   0x8   : > { %p35_p4 = scmp.eq.s32.totalorder %s33_s25, 0  ;;  %192 = sbr.rel (%p2053_p5) target bundleno = 35 (0x23), region = 32 }
   0xa   : > { %s2485_s27 = scalar_select %p35_p4, %s2393_s19, %s37_s26  }
   0xf   : > { %195 = sbr.rel (!%p46_p3) target bundleno = 35 (0x23), region = 36  ;;  %s197_s28 = sand.u32 (%p46_p3), 1, %s2393_s19  }
  0x10   : > { %s2226_s29 = smul.u32 (%p46_p3), 120, %s2401_s21 }
  0x11   : > { %s2225_s30 = smul.u32 (%p46_p3), 240, %s197_s28 }
  0x12   : > { %s2493_s8 = scalar_lea.vmem (%p46_p3), %s3372_s0, %s2226_s29 }
  0x13   : > { %v221_v0 = vld [vmem:[%s2493_s8] sm:$0xff] (%p46_p3)   ;;  %v225_v1 = vld [vmem:[%s2493_s8 + $0x8] sm:$0xff] (%p46_p3)   ;;  %v229_v2 = vld [vmem:[%s2493_s8 + $0x10] sm:$0xff] (%p46_p3)   ;;  %s2498_s9 = scalar_lea.vmem (%p46_p3), [#allocation3], %s2225_s30 }
  0x14   : > { %222 = vst [vmem:[%s2498_s9] sm:$0xff] (%p46_p3), %v221_v0   ;;  %226 = vst [vmem:[%s2498_s9 + $0x8] sm:$0xff] (%p46_p3), %v225_v1   ;;  %v233_v3 = vld [vmem:[%s2493_s8 + $0x18] sm:$0xff] (%p46_p3)   ;;  %v237_v4 = vld [vmem:[%s2493_s8 + $0x20] sm:$0xff] (%p46_p3)  }
  0x15   : > { %230 = vst [vmem:[%s2498_s9 + $0x10] sm:$0xff] (%p46_p3), %v229_v2   ;;  %v241_v5 = vld [vmem:[%s2493_s8 + $0x28] sm:$0xff] (%p46_p3)   ;;  %234 = vst [vmem:[%s2498_s9 + $0x18] sm:$0xff] (%p46_p3), %v233_v3   ;;  %v245_v6 = vld [vmem:[%s2493_s8 + $0x30] sm:$0xff] (%p46_p3)  }
  0x16   : > { %238 = vst [vmem:[%s2498_s9 + $0x20] sm:$0xff] %v237_v4   ;;  %242 = vst [vmem:[%s2498_s9 + $0x28] sm:$0xff] %v241_v5   ;;  %v249_v7 = vld [vmem:[%s2493_s8 + $0x38] sm:$0xff]   ;;  %v253_v8 = vld [vmem:[%s2493_s8 + $0x40] sm:$0xff]  }
  0x17   : > { %246 = vst [vmem:[%s2498_s9 + $0x30] sm:$0xff] %v245_v6   ;;  %250 = vst [vmem:[%s2498_s9 + $0x38] sm:$0xff] %v249_v7   ;;  %v257_v9 = vld [vmem:[%s2493_s8 + $0x48] sm:$0xff]   ;;  %v261_v10 = vld [vmem:[%s2493_s8 + $0x50] sm:$0xff]  }
  0x18   : > { %254 = vst [vmem:[%s2498_s9 + $0x40] sm:$0xff] %v253_v8   ;;  %v265_v11 = vld [vmem:[%s2493_s8 + $0x58] sm:$0xff]   ;;  %258 = vst [vmem:[%s2498_s9 + $0x48] sm:$0xff] %v257_v9   ;;  %v269_v12 = vld [vmem:[%s2493_s8 + $0x60] sm:$0xff]  }
  0x19   : > { %262 = vst [vmem:[%s2498_s9 + $0x50] sm:$0xff] %v261_v10   ;;  %266 = vst [vmem:[%s2498_s9 + $0x58] sm:$0xff] %v265_v11   ;;  %v273_v13 = vld [vmem:[%s2493_s8 + $0x68] sm:$0xff]   ;;  %v277_v14 = vld [vmem:[%s2493_s8 + $0x70] sm:$0xff]  }
  0x1a   : > { %270 = vst [vmem:[%s2498_s9 + $0x60] sm:$0xff] %v269_v12   ;;  %274 = vst [vmem:[%s2498_s9 + $0x68] sm:$0xff] %v273_v13   ;;  %v281_v15 = vld [vmem:[%s2493_s8 + $0xf0] sm:$0xff]   ;;  %v285_v16 = vld [vmem:[%s2493_s8 + $0xf8] sm:$0xff]  }
  0x1b   : > { %278 = vst [vmem:[%s2498_s9 + $0x70] sm:$0xff] %v277_v14   ;;  %v289_v17 = vld [vmem:[%s2493_s8 + $0x100] sm:$0xff]   ;;  %282 = vst [vmem:[%s2498_s9 + $0x78] sm:$0xff] %v281_v15   ;;  %v293_v18 = vld [vmem:[%s2493_s8 + $0x108] sm:$0xff]  }
  0x1c   : > { %286 = vst [vmem:[%s2498_s9 + $0x80] sm:$0xff] %v285_v16   ;;  %290 = vst [vmem:[%s2498_s9 + $0x88] sm:$0xff] %v289_v17   ;;  %v297_v19 = vld [vmem:[%s2493_s8 + $0x110] sm:$0xff]   ;;  %v301_v20 = vld [vmem:[%s2493_s8 + $0x118] sm:$0xff]  }
  0x1d   : > { %294 = vst [vmem:[%s2498_s9 + $0x90] sm:$0xff] %v293_v18   ;;  %298 = vst [vmem:[%s2498_s9 + $0x98] sm:$0xff] %v297_v19   ;;  %v305_v21 = vld [vmem:[%s2493_s8 + $0x120] sm:$0xff]   ;;  %v309_v22 = vld [vmem:[%s2493_s8 + $0x128] sm:$0xff]  }
  0x1e   : > { %302 = vst [vmem:[%s2498_s9 + $0xa0] sm:$0xff] %v301_v20   ;;  %v313_v23 = vld [vmem:[%s2493_s8 + $0x130] sm:$0xff]   ;;  %306 = vst [vmem:[%s2498_s9 + $0xa8] sm:$0xff] %v305_v21   ;;  %v317_v24 = vld [vmem:[%s2493_s8 + $0x138] sm:$0xff]  }
  0x1f   : > { %310 = vst [vmem:[%s2498_s9 + $0xb0] sm:$0xff] %v309_v22   ;;  %314 = vst [vmem:[%s2498_s9 + $0xb8] sm:$0xff] %v313_v23   ;;  %v321_v25 = vld [vmem:[%s2493_s8 + $0x140] sm:$0xff]   ;;  %v325_v26 = vld [vmem:[%s2493_s8 + $0x148] sm:$0xff]  }
  0x20   : > { %318 = vst [vmem:[%s2498_s9 + $0xc0] sm:$0xff] %v317_v24   ;;  %322 = vst [vmem:[%s2498_s9 + $0xc8] sm:$0xff] %v321_v25   ;;  %v329_v27 = vld [vmem:[%s2493_s8 + $0x150] sm:$0xff]   ;;  %v333_v28 = vld [vmem:[%s2493_s8 + $0x158] sm:$0xff]  }
  0x21   : > { %326 = vst [vmem:[%s2498_s9 + $0xd0] sm:$0xff] %v325_v26   ;;  %v337_v29 = vld [vmem:[%s2493_s8 + $0x160] sm:$0xff]   ;;  %330 = vst [vmem:[%s2498_s9 + $0xd8] sm:$0xff] %v329_v27  }
  0x22   : > { %334 = vst [vmem:[%s2498_s9 + $0xe0] sm:$0xff] %v333_v28   ;;  %338 = vst [vmem:[%s2498_s9 + $0xe8] sm:$0xff] %v337_v29  }
  0x23 PF: > { %p2055_p6 = scmp.ge.s32.totalorder %s2405_s22, 1  ;;  %p482_p7 = scmp.lt.s32.totalorder %s2405_s22, 3 }
  0x25   : > { %p483_p8 = pnand %p2055_p6, %p482_p7 }
  0x26   : > { %s489_s10 = sand.u32 (!%p483_p8), 1, %s2389_s18   ;;  %p2056_p9 = scmp.ne.s32.totalorder (!%p483_p8), %s2397_s20, 0 }
  0x27   : > { %486 = sbr.rel (%p483_p8) target bundleno = 920 (0x398), region = 77 }
  0x28   : > { %s2227_s11 = smul.u32 (!%p483_p8), 240, %s489_s10 }
  0x2a   : > { %s2560_s12 = scalar_lea.vmem (!%p483_p8), [#allocation3], %s2227_s11 }
  0x2e   : > { %516 = sbr.rel (%p2056_p9) target bundleno = 53 (0x35), region = 85  ;;  %v2407_v30 = vmov (!%p2056_p9), 0.0  }
  0x2f   : > { %517 = vst [vmem:[#allocation2] sm:$0x3] (!%p2056_p9), %v2407_v30 }
  0x35 PF: > { %v2564_v31 = vld [vmem:[%s2560_s12 + $0x78] sm:$0xff]   ;;  %v2287_v32 = vld [vmem:[%s2560_s12 + $0x80] ss:$0 sps:$4 sm:$0x11]   ;;  %vm931_vm0 = vcmask 1046528   ;;  %v2575_v40 = vld [vmem:[%s2560_s12 + $0xc] sm:$0xff]  }
  0x36   : > { %v956_v33 = vrot.slane %v2564_v31, 1  ;;  %v957_v34 = vrot.slane %v2287_v32, 1  ;;  %v2569_v35 = vld [vmem:[%s2560_s12] sm:$0xff]   ;;  %v2289_v36 = vld [vmem:[%s2560_s12 + $0x8] ss:$0 sps:$4 sm:$0x11]  }
  0x37   : > { %v932_v38 = vrot.slane %v2569_v35, 1  ;;  %v933_v39 = vrot.slane %v2289_v36, 1  ;;  %v2291_v41 = vld [vmem:[%s2560_s12 + $0x14] ss:$0 sps:$4 sm:$0x11]   ;;  %s2408_s13 = smov 8  }
  0x38   : > { %v958_v37 = vsel %vm931_vm0, %v956_v33, %v957_v34  ;;  %vm706_vm1 = vsmask.f32 7424  ;;  %v708_v42 = vshrl.u32 %v2569_v35, 16  ;;  %v710_v43 = vshll.u32 %v2569_v35, 16  ;;  %v2585_v49 = vld [vmem:[%s2560_s12 + $0x84] sm:$0xff]   ;;  %s2409_s14 = smov 4  }
  0x39   : > { %996 = vrot.lane.b32.xlu1 %v958_v37, %s2408_s13  ;;  %v715_v44 = vshll.u32 %v2289_v36, 16  ;;  %v934_v45 = vsel %vm931_vm0, %v932_v38, %v933_v39  ;;  %v720_v46 = vshrl.u32 %v2575_v40, 16  ;;  %v722_v47 = vshll.u32 %v2575_v40, 16  ;;  %v2293_v54 = vld [vmem:[%s2560_s12 + $0x8c] ss:$0 sps:$4 sm:$0x11]  }
  0x3a   : > { %v727_v48 = vshll.u32 %v2291_v41, 16  ;;  %980 = vrot.lane.b32.xlu0 %v934_v45, %s2408_s13  ;;  %v712_v50 = vrot.slane %v710_v43, 1  ;;  %v816_v55 = vshrl.u32 %v2585_v49, 16  ;;  %v818_v57 = vshll.u32 %v2585_v49, 16  ;;  %v2605_v14 = vld [vmem:[%s2560_s12 + $0x18] sm:$0xff]   ;;  %v2609_v16 = vld [vmem:[%s2560_s12 + $0x90] sm:$0xff]  }
  0x3b   : > { %v717_v51 = vrot.slane %v715_v44, 1  ;;  %v724_v52 = vrot.slane %v722_v47, 1  ;;  %v804_v58 = vshrl.u32 %v2564_v31, 16  ;;  %v806_v59 = vshll.u32 %v2564_v31, 16  ;;  %s2410_s15 = smov 12   ;;  %s2411_s16 = smov 16  }
  0x3c   : > { %v729_v53 = vrot.slane %v727_v48, 1  ;;  %v713_v56 = vor.u32 %v712_v50, %v708_v42  ;;  %v823_v61 = vshll.u32 %v2293_v54, 16  ;;  %v811_v62 = vshll.u32 %v2287_v32, 16  ;;  %v2296_v17 = vld [vmem:[%s2560_s12 + $0x98] ss:$0 sps:$4 sm:$0x11]  }
  0x3d   : > { %v725_v60 = vor.u32 %v724_v52, %v720_v46  ;;  %v820_v0 = vrot.slane %v818_v57, 1  ;;  %v808_v1 = vrot.slane %v806_v59, 1  ;;  %v935_v7 = vrot.slane %v2575_v40, 1  ;;  %v2297_v18 = vld [vmem:[%s2560_s12 + $0x20] ss:$0 sps:$4 sm:$0x11]  }
  0x3e   : > { %v718_v63 = vsel %vm706_vm1, %v713_v56, %v717_v51  ;;  %v825_v3 = vrot.slane %v823_v61, 1  ;;  %v813_v4 = vrot.slane %v811_v62, 1  ;;  %v936_v8 = vrot.slane %v2291_v41, 1  ;;  %v2636_v34 = vld [vmem:[%s2560_s12 + $0x24] sm:$0xff]   ;;  %v2645_v41 = vld [vmem:[%s2560_s12 + $0x9c] sm:$0xff]   ;;  %s2412_s17 = smov 20  }
  0x3f   : > { %v730_v2 = vsel %vm706_vm1, %v725_v60, %v729_v53  ;;  %899 = vrot.lane.b32.xlu0 %v718_v63, %s2409_s14  ;;  %v821_v5 = vor.u32 %v820_v0, %v816_v55  ;;  %v809_v6 = vor.u32 %v808_v1, %v804_v58  ;;  %v959_v9 = vrot.slane %v2585_v49, 1  ;;  %v2301_v45 = vld [vmem:[%s2560_s12 + $0x2c] ss:$0 sps:$4 sm:$0x11]   ;;  %v2314_v52 = vld [vmem:[%s3373_s1] sm:$0xff]   ;;  %s2413_s26 = smov 24  }
  0x40   : > { %901 = vrot.lane.b32.xlu1 %v730_v2, %s2409_s14  ;;  %v960_v10 = vrot.slane %v2293_v54, 1  ;;  %v937_v13 = vsel %vm931_vm0, %v935_v7, %v936_v8  ;;  %v734_v19 = vshll.u32 %v2605_v14, 16  ;;  %v830_v20 = vshll.u32 %v2609_v16, 16  ;;  %v2300_v50 = vld [vmem:[%s2560_s12 + $0xa4] ss:$0 sps:$4 sm:$0x11]   ;;  %2159 = vmatprep.subr.bf16.mxu0 %v2314_v52 }
  0x41   : > { %v826_v11 = vsel %vm706_vm1, %v821_v5, %v825_v3  ;;  %v814_v12 = vsel %vm706_vm1, %v809_v6, %v813_v4  ;;  %v835_v21 = vshll.u32 %v2296_v17, 16  ;;  %v732_v22 = vshrl.u32 %v2605_v14, 16  ;;  %2217 = vmatprep.subr.bf16.mxu1 %v2314_v52  ;;  %2160 = vmatpush3.bf16.msra.mxu0 %v2314_v52  ;;  %v2315_v56 = vld [vmem:[%s3373_s1 + $0x8] sm:$0xff]   ;;  %v2318_v61 = vld [vmem:[%s3373_s1 + $0x10] ss:$0 sps:$4 sm:$0x33]  }
  0x42   : > { %v961_v15 = vsel %vm931_vm0, %v959_v9, %v960_v10  ;;  %v736_v23 = vrot.slane %v734_v19, 1  ;;  %v739_v24 = vshll.u32 %v2297_v18, 16  ;;  %v828_v25 = vshrl.u32 %v2609_v16, 16  ;;  %2220 = vmatpush3.bf16.msra.mxu1 %v2314_v52  ;;  %2161 = vmatprep.subr.bf16.mxu0 %v2315_v56  ;;  %s2414_s7 = smov 28   ;;  %s2415_s8 = smov 32   ;;  %v2701_v7 = vld [vmem:[%s2560_s12 + $0x30] sm:$0xff]  }
  0x43   : > { %915 = vrot.lane.b32.xlu0 %v814_v12, %s2409_s14  ;;  %v832_v26 = vrot.slane %v830_v20, 1  ;;  %v837_v27 = vrot.slane %v835_v21, 1  ;;  %v938_v36 = vrot.slane %v2605_v14, 1  ;;  %v939_v37 = vrot.slane %v2297_v18, 1  ;;  %2218 = vmatprep.subr.bf16.mxu1 %v2315_v56  ;;  %v2704_v8 = vld [vmem:[%s2560_s12 + $0xa8] sm:$0xff]   ;;  %p2117_p10 = scmp.ne.s32.totalorder %s2397_s20, 1 }
  0x44   : > { %917 = vrot.lane.b32.xlu1 %v826_v11, %s2409_s14  ;;  %v737_v28 = vor.u32 %v736_v23, %v732_v22  ;;  %v741_v29 = vrot.slane %v739_v24, 1  ;;  %v962_v38 = vrot.slane %v2609_v16, 1  ;;  %v963_v39 = vrot.slane %v2296_v17, 1  ;;  %v2305_v9 = vld [vmem:[%s2560_s12 + $0x38] ss:$0 sps:$4 sm:$0x11]  }
  0x45   : > { %v833_v30 = vor.u32 %v832_v26, %v828_v25  ;;  %v746_v42 = vshll.u32 %v2636_v34, 16  ;;  %v940_v43 = vsel %vm931_vm0, %v938_v36, %v939_v37  ;;  %v842_v46 = vshll.u32 %v2645_v41, 16  ;;  %2162 = vmatpush3.bf16.msra.mxu0 %v2315_v56  ;;  %v2738_v37 = vld [vmem:[%s2560_s12 + $0xb4] sm:$0xff]  }
  0x46   : > { %v2630_v32 = vsel %vm706_vm1, %v737_v28, %v741_v29  ;;  %v964_v44 = vsel %vm931_vm0, %v962_v38, %v963_v39  ;;  %v744_v47 = vshrl.u32 %v2636_v34, 16  ;;  %v751_v51 = vshll.u32 %v2301_v45, 16  ;;  %2221 = vmatpush3.bf16.msra.mxu1 %v2315_v56  ;;  %v2309_v38 = vld [vmem:[%s2560_s12 + $0x44] ss:$0 sps:$4 sm:$0x11]  }
  0x47   : > { %982 = vrot.lane.b32.xlu0 %v937_v13, %s2408_s13  ;;  %v2633_v33 = vsel %vm706_vm1, %v833_v30, %v837_v27  ;;  %v748_v48 = vrot.slane %v746_v42, 1  ;;  %v840_v53 = vshrl.u32 %v2645_v41, 16  ;;  %v844_v54 = vrot.slane %v842_v46, 1  ;;  %v2308_v42 = vld [vmem:[%s2560_s12 + $0xbc] ss:$0 sps:$4 sm:$0x11]  }
  0x48   : > { %998 = vrot.lane.b32.xlu1 %v961_v15, %s2408_s13  ;;  %v847_v55 = vshll.u32 %v2300_v50, 16  ;;  %v753_v58 = vrot.slane %v751_v51, 1  ;;  %vm1620_vm2 = vcmask 1041408   ;;  %v941_v1 = vrot.slane %v2636_v34, 1 }
  0x49   : > { %v749_v57 = vor.u32 %v748_v48, %v744_v47  ;;  %v845_v59 = vor.u32 %v844_v54, %v840_v53  ;;  %2223 = vmatprep.subr.msk.bf16.mxu0 %vm1620_vm2, %v2318_v61  ;;  %v1622_v63 = vsel %vm1620_vm2, %v2318_v61, 0  ;;  %2224 = vmatprep.subr.msk.bf16.mxu1 %vm1620_vm2, %v2318_v61  ;;  %v965_v3 = vrot.slane %v2645_v41, 1 }
  0x4a   : > { %v849_v60 = vrot.slane %v847_v55, 1  ;;  %2164 = vmatpush3.bf16.msra.mxu0 %v1622_v63  ;;  %2222 = vmatpush3.bf16.msra.mxu1 %v1622_v63  ;;  %v966_v4 = vrot.slane %v2300_v50, 1  ;;  %v758_v10 = vshll.u32 %v2701_v7, 16  ;;  %v854_v12 = vshll.u32 %v2704_v8, 16 }
  0x4b   : > { %1022 = vrot.lane.b32.xlu0 %v2575_v40, %s2410_s15  ;;  %v754_v62 = vsel %vm706_vm1, %v749_v57, %v753_v58  ;;  %v763_v17 = vshll.u32 %v2305_v9, 16  ;;  %v852_v18 = vshrl.u32 %v2704_v8, 16  ;;  %v944_v27 = vrot.slane %v2701_v7, 1 }
  0x4c   : > { %1038 = vrot.lane.b32.xlu1 %v2585_v49, %s2410_s15  ;;  %v850_v0 = vsel %vm706_vm1, %v845_v59, %v849_v60  ;;  %v967_v6 = vsel %vm931_vm0, %v965_v3, %v966_v4  ;;  %v856_v19 = vrot.slane %v854_v12, 1  ;;  %v945_v28 = vrot.slane %v2305_v9, 1 }
  0x4d   : > { %v765_v22 = vrot.slane %v763_v17, 1  ;;  %v968_v29 = vrot.slane %v2704_v8, 1  ;;  %v775_v46 = vshll.u32 %v2309_v38, 16  ;;  %v864_v47 = vshrl.u32 %v2738_v37, 16  ;;  %v2806_v17 = vld [vmem:[%s2560_s12 + $0xc0] sm:$0xff]  }
  0x4e   : > { %v857_v23 = vor.u32 %v856_v19, %v852_v18  ;;  %v871_v50 = vshll.u32 %v2308_v42, 16  ;;  %v2313_v19 = vld [vmem:[%s2560_s12 + $0x50] ss:$0 sps:$4 sm:$0x11]   ;;  %vm1296_vm3 = vcmask 31744   ;;  %vm1329_vm4 = vcmask 64512  }
  0x4f   : > { %1024 = vrot.lane.b32.xlu0 %v2605_v14, %s2410_s15  ;;  %v777_v52 = vrot.slane %v775_v46, 1  ;;  %vm1362_vm5 = vcmask 97280   ;;  %vm1395_vm6 = vcmask 130048   ;;  %vm1428_vm7 = vcmask 162816  }
  0x50   : > { %1040 = vrot.lane.b32.xlu1 %v2609_v16, %s2410_s15  ;;  %v873_v54 = vrot.slane %v871_v50, 1  ;;  %vm1461_vm8 = vcmask 195584   ;;  %vm1494_vm9 = vcmask 228352   ;;  %vm1527_vm10 = vcmask 261120  }
  0x51   : > { %vm1587_vm11 = vcmask 293888   ;;  %vm1859_vm12 = vcmask 1040384   ;;  %vm2417_vm13 = vmmov (!%p2117_p10), 0  }
  0x53   : > { %1084 = vrot.lane.b32.xlu0 %v730_v2, %s2411_s16  ;;  %v942_v2 = vrot.slane %v2301_v45, 1 }
  0x54   : > { %1100 = vrot.lane.b32.xlu1 %v826_v11, %s2411_s16  ;;  %v2304_v11 = vld [vmem:[%s2560_s12 + $0xb0] ss:$0 sps:$4 sm:$0x11]  }
  0x55   : > { %v943_v5 = vsel %vm931_vm0, %v941_v1, %v942_v2  ;;  %v859_v20 = vshll.u32 %v2304_v11, 16  ;;  %v969_v30 = vrot.slane %v2304_v11, 1  ;;  %v972_v1 = vrot.slane %v2308_v42, 1 }
  0x57   : > { %1086 = vrot.lane.b32.xlu0 %v2630_v32, %s2411_s16  ;;  %v861_v24 = vrot.slane %v859_v20, 1  ;;  %v970_v36 = vsel %vm931_vm0, %v968_v29, %v969_v30  ;;  %v876_v29 = vshrl.u32 %v2806_v17, 16 }
  0x58   : > { %1102 = vrot.lane.b32.xlu1 %v2633_v33, %s2411_s16 }
  0x59   : > { %v862_v26 = vsel %vm706_vm1, %v857_v23, %v861_v24  ;;  %v878_v23 = vshll.u32 %v2806_v17, 16 }
  0x5b   : > { %1122 = vrot.lane.b32.xlu0 %v937_v13, %s2412_s17  ;;  %v756_v13 = vshrl.u32 %v2701_v7, 16  ;;  %v880_v30 = vrot.slane %v878_v23, 1 }
  0x5c   : > { %1138 = vrot.lane.b32.xlu1 %v961_v15, %s2412_s17  ;;  %v760_v15 = vrot.slane %v758_v10, 1 }
  0x5e   : > { %v761_v21 = vor.u32 %v760_v15, %v756_v13  ;;  %v2801_v13 = vld [vmem:[%s2560_s12 + $0x48] sm:$0xff]  }
  0x5f   : > { %1124 = vrot.lane.b32.xlu0 %v940_v43, %s2412_s17  ;;  %v782_v20 = vshll.u32 %v2801_v13, 16 }
  0x60   : > { %1140 = vrot.lane.b32.xlu1 %v964_v44, %s2412_s17  ;;  %v766_v25 = vsel %vm706_vm1, %v761_v21, %v765_v22  ;;  %v2312_v22 = vld [vmem:[%s2560_s12 + $0xc8] ss:$0 sps:$4 sm:$0x11]  }
  0x63   : > { %1164 = vrot.lane.b32.xlu0 %v2605_v14, %s2413_s26 }
  0x64   : > { %1180 = vrot.lane.b32.xlu1 %v2609_v16, %s2413_s26 }
  0x67   : > { %1166 = vrot.lane.b32.xlu0 %v2636_v34, %s2413_s26 }
  0x68   : > { %1182 = vrot.lane.b32.xlu1 %v2645_v41, %s2413_s26 }
  0x6b   : > { %1226 = vrot.lane.b32.xlu0 %v2630_v32, %s2414_s7 }
  0x6c   : > { %1242 = vrot.lane.b32.xlu1 %v2633_v33, %s2414_s7 }
  0x6f   : > { %1228 = vrot.lane.b32.xlu0 %v754_v62, %s2414_s7 }
  0x70   : > { %1244 = vrot.lane.b32.xlu1 %v850_v0, %s2414_s7 }
  0x73   : > { %1264 = vrot.lane.b32.xlu0 %v940_v43, %s2415_s8 }
  0x74   : > { %1280 = vrot.lane.b32.xlu1 %v964_v44, %s2415_s8 }
  0x77   : > { %903 = vrot.lane.b32.xlu0 %v2630_v32, %s2409_s14  ;;  %v946_v32 = vsel %vm931_vm0, %v944_v27, %v945_v28  ;;  %v787_v27 = vshll.u32 %v2313_v19, 16 }
  0x78   : > { %919 = vrot.lane.b32.xlu1 %v2633_v33, %s2409_s14  ;;  %v2734_v33 = vld [vmem:[%s2560_s12 + $0x3c] sm:$0xff]  }
  0x79   : > { %v770_v39 = vshll.u32 %v2734_v33, 16  ;;  %v947_v61 = vrot.slane %v2734_v33, 1 }
  0x7b   : > { %1266 = vrot.lane.b32.xlu0 %v943_v5, %s2415_s8  ;;  %v772_v45 = vrot.slane %v770_v39, 1  ;;  %v789_v39 = vrot.slane %v787_v27, 1 }
  0x7c   : > { %1282 = vrot.lane.b32.xlu1 %v967_v6, %s2415_s8 }
  0x7f   : > { %905 = vrot.lane.b32.xlu0 %v754_v62, %s2409_s14 }
  0x80   : > { %921 = vrot.lane.b32.xlu1 %v850_v0, %s2409_s14 }
  0x83   : > { %984 = vrot.lane.b32.xlu0 %v940_v43, %s2408_s13  ;;  %v866_v43 = vshll.u32 %v2738_v37, 16 }
  0x84   : > { %1000 = vrot.lane.b32.xlu1 %v964_v44, %s2408_s13  ;;  %v768_v44 = vshrl.u32 %v2734_v33, 16 }
  0x85   : > { %v868_v48 = vrot.slane %v866_v43, 1  ;;  %v881_v43 = vor.u32 %v880_v30, %v876_v29 }
  0x86   : > { %v773_v51 = vor.u32 %v772_v45, %v768_v44 }
  0x87   : > { %986 = vrot.lane.b32.xlu0 %v943_v5, %s2408_s13  ;;  %v869_v53 = vor.u32 %v868_v48, %v864_v47 }
  0x88   : > { %1002 = vrot.lane.b32.xlu1 %v967_v6, %s2408_s13  ;;  %v778_v57 = vsel %vm706_vm1, %v773_v51, %v777_v52  ;;  %v950_v51 = vrot.slane %v2801_v13, 1  ;;  %v951_v52 = vrot.slane %v2313_v19, 1 }
  0x89   : > { %v874_v58 = vsel %vm706_vm1, %v869_v53, %v873_v54  ;;  %v974_v54 = vrot.slane %v2806_v17, 1 }
  0x8b   : > { %1026 = vrot.lane.b32.xlu0 %v2636_v34, %s2410_s15 }
  0x8c   : > { %1042 = vrot.lane.b32.xlu1 %v2645_v41, %s2410_s15 }
  0x8f   : > { %1028 = vrot.lane.b32.xlu0 %v2701_v7, %s2410_s15 }
  0x90   : > { %1044 = vrot.lane.b32.xlu1 %v2704_v8, %s2410_s15 }
  0x93   : > { %1088 = vrot.lane.b32.xlu0 %v754_v62, %s2411_s16  ;;  %v948_v62 = vrot.slane %v2309_v38, 1 }
  0x94   : > { %1104 = vrot.lane.b32.xlu1 %v850_v0, %s2411_s16  ;;  %v971_v0 = vrot.slane %v2738_v37, 1 }
  0x95   : > { %v949_v3 = vsel %vm931_vm0, %v947_v61, %v948_v62  ;;  %v2855_v61 = vsel %vm931_vm0, %v950_v51, %v951_v52  ;;  %v2858_v62 = vld [vmem:[%s2560_s12 + $0x54] sm:$0xff]  }
  0x97   : > { %1090 = vrot.lane.b32.xlu0 %v766_v25, %s2411_s16 }
  0x98   : > { %1106 = vrot.lane.b32.xlu1 %v862_v26, %s2411_s16 }
  0x9b   : > { %1126 = vrot.lane.b32.xlu0 %v943_v5, %s2412_s17  ;;  %v973_v5 = vsel %vm931_vm0, %v971_v0, %v972_v1 }
  0x9c   : > { %1142 = vrot.lane.b32.xlu1 %v967_v6, %s2412_s17 }
  0x9f   : > { %1128 = vrot.lane.b32.xlu0 %v946_v32, %s2412_s17 }
  0xa0   : > { %1144 = vrot.lane.b32.xlu1 %v970_v36, %s2412_s17 }
  0xa3   : > { %1168 = vrot.lane.b32.xlu0 %v2701_v7, %s2413_s26 }
  0xa4   : > { %1184 = vrot.lane.b32.xlu1 %v2704_v8, %s2413_s26 }
  0xa7   : > { %1170 = vrot.lane.b32.xlu0 %v2734_v33, %s2413_s26 }
  0xa8   : > { %1186 = vrot.lane.b32.xlu1 %v2738_v37, %s2413_s26 }
  0xab   : > { %1230 = vrot.lane.b32.xlu0 %v766_v25, %s2414_s7  ;;  %v2758_v55 = vpop.permute.xlu1 %996 }
  0xac   : > { %1246 = vrot.lane.b32.xlu1 %v862_v26, %s2414_s7  ;;  %v2760_v56 = vpop.permute.xlu0 %980 }
  0xaf   : > { %1232 = vrot.lane.b32.xlu0 %v778_v57, %s2414_s7 }
  0xb0   : > { %1248 = vrot.lane.b32.xlu1 %v874_v58, %s2414_s7 }
  0xb1   : > { %v2766_v59 = vpop.permute.xlu0 %899 }
  0xb2   : > { %v2768_v60 = vpop.permute.xlu1 %901  ;;  %v1298_v0 = vsel %vm1296_vm3, %v2569_v35, %v2766_v59  ;;  %v2879_v59 = vld [vmem:[%s2560_s12 + $0x5c] ss:$0 sps:$4 sm:$0x11]  }
  0xb3   : > { %1268 = vrot.lane.b32.xlu0 %v946_v32, %s2415_s8  ;;  %v1331_v35 = vsel %vm1329_vm4, %v1298_v0, %v2760_v56 }
  0xb4   : > { %1284 = vrot.lane.b32.xlu1 %v970_v36, %s2415_s8 }
  0xb5   : > { %v2773_v63 = vpop.permute.xlu0 %915 }
  0xb6   : > { %v2776_v2 = vpop.permute.xlu1 %917 }
  0xb7   : > { %907 = vrot.lane.b32.xlu0 %v766_v25, %s2409_s14  ;;  %v780_v25 = vshrl.u32 %v2801_v13, 16 }
  0xb8   : > { %923 = vrot.lane.b32.xlu1 %v862_v26, %s2409_s14  ;;  %v784_v26 = vrot.slane %v782_v20, 1  ;;  %v2867_v20 = vld [vmem:[%s2560_s12 + $0xcc] sm:$0xff]  }
  0xb9   : > { %v2781_v4 = vpop.permute.xlu0 %982  ;;  %v890_v56 = vshll.u32 %v2867_v20, 16  ;;  %v888_v30 = vshrl.u32 %v2867_v20, 16 }
  0xba   : > { %v2784_v6 = vpop.permute.xlu1 %998  ;;  %v785_v38 = vor.u32 %v784_v26, %v780_v25  ;;  %v2887_v25 = vld [vmem:[%s2560_s12 + $0xd4] ss:$0 sps:$4 sm:$0x11]  }
  0xbb   : > { %1270 = vrot.lane.b32.xlu0 %v949_v3, %s2415_s8  ;;  %v895_v51 = vshll.u32 %v2887_v25, 16 }
  0xbc   : > { %1286 = vrot.lane.b32.xlu1 %v973_v5, %s2415_s8  ;;  %v2837_v46 = vsel %vm706_vm1, %v785_v38, %v789_v39  ;;  %v799_v39 = vshll.u32 %v2879_v59, 16 }
  0xbd   : > { %v2788_v9 = vpop.permute.xlu0 %1022 }
  0xbe   : > { %v2790_v10 = vpop.permute.xlu1 %1038 }
  0xbf   : > { %909 = vrot.lane.b32.xlu0 %v778_v57, %s2409_s14 }
  0xc0   : > { %925 = vrot.lane.b32.xlu1 %v874_v58, %s2409_s14 }
  0xc1   : > { %v2794_v11 = vpop.permute.xlu0 %1024 }
  0xc2   : > { %v2796_v12 = vpop.permute.xlu1 %1040 }
  0xc3   : > { %988 = vrot.lane.b32.xlu0 %v946_v32, %s2408_s13  ;;  %v883_v32 = vshll.u32 %v2312_v22, 16 }
  0xc4   : > { %1004 = vrot.lane.b32.xlu1 %v970_v36, %s2408_s13 }
  0xc5   : > { %v2803_v15 = vpop.permute.xlu0 %1084  ;;  %v885_v44 = vrot.slane %v883_v32, 1  ;;  %v792_v32 = vshrl.u32 %v2858_v62, 16 }
  0xc6   : > { %v2808_v18 = vpop.permute.xlu1 %1100 }
  0xc7   : > { %990 = vrot.lane.b32.xlu0 %v949_v3, %s2408_s13  ;;  %v2840_v48 = vsel %vm706_vm1, %v881_v43, %v885_v44  ;;  %v892_v44 = vrot.slane %v890_v56, 1 }
  0xc8   : > { %1006 = vrot.lane.b32.xlu1 %v973_v5, %s2408_s13 }
  0xc9   : > { %v2814_v21 = vpop.permute.xlu0 %1086 }
  0xca   : > { %v2818_v24 = vpop.permute.xlu1 %1102 }
  0xcb   : > { %1030 = vrot.lane.b32.xlu0 %v2734_v33, %s2410_s15 }
  0xcc   : > { %1046 = vrot.lane.b32.xlu1 %v2738_v37, %s2410_s15 }
  0xcd   : > { %v1123_v28 = vpop.permute.xlu0 %1122 }
  0xce   : > { %v1139_v36 = vpop.permute.xlu1 %1138 }
  0xcf   : > { %1032 = vrot.lane.b32.xlu0 %v2801_v13, %s2410_s15 }
  0xd0   : > { %1048 = vrot.lane.b32.xlu1 %v2806_v17, %s2410_s15 }
  0xd1   : > { %v2830_v42 = vpop.permute.xlu0 %1124 }
  0xd2   : > { %v2832_v45 = vpop.permute.xlu1 %1140 }
  0xd3   : > { %1092 = vrot.lane.b32.xlu0 %v778_v57, %s2411_s16  ;;  %v975_v57 = vrot.slane %v2312_v22, 1  ;;  %v794_v22 = vshll.u32 %v2858_v62, 16 }
  0xd4   : > { %1108 = vrot.lane.b32.xlu1 %v874_v58, %s2411_s16 }
  0xd5   : > { %v1165_v47 = vpop.permute.xlu0 %1164  ;;  %v2864_v19 = vsel %vm931_vm0, %v974_v54, %v975_v57  ;;  %v1316_v57 = vsel %vm1296_vm3, %v2585_v49, %v2776_v2  ;;  %v897_v49 = vrot.slane %v895_v51, 1 }
  0xd6   : > { %v1181_v50 = vpop.permute.xlu1 %1180 }
  0xd7   : > { %1094 = vrot.lane.b32.xlu0 %v2837_v46, %s2411_s16 }
  0xd8   : > { %1110 = vrot.lane.b32.xlu1 %v2840_v48, %s2411_s16 }
  0xd9   : > { %v2847_v53 = vpop.permute.xlu0 %1166 }
  0xda   : > { %v2850_v58 = vpop.permute.xlu1 %1182 }
  0xdb   : > { %1130 = vrot.lane.b32.xlu0 %v949_v3, %s2412_s17  ;;  %v1314_v3 = vsel %vm1296_vm3, %v2564_v31, %v2773_v63  ;;  %v1364_v63 = vsel %vm1362_vm5, %v1331_v35, %v2788_v9  ;;  %v893_v35 = vor.u32 %v892_v44, %v888_v30  ;;  %v977_v30 = vrot.slane %v2867_v20, 1  ;;  %v3018_v44 = vld [vmem:[%s2560_s12 + $0xd8] sm:$0xff]  }
  0xdc   : > { %1146 = vrot.lane.b32.xlu1 %v973_v5, %s2412_s17  ;;  %v1347_v31 = vsel %vm1329_vm4, %v1314_v3, %v2758_v55  ;;  %v1397_v27 = vsel %vm1395_vm6, %v1364_v63, %v2803_v15  ;;  %v796_v15 = vrot.slane %v794_v22, 1 }
  0xdd   : > { %v1227_v1 = vpop.permute.xlu0 %1226  ;;  %v1380_v26 = vsel %vm1362_vm5, %v1347_v31, %v2790_v10  ;;  %v1430_v9 = vsel %vm1428_vm7, %v1397_v27, %v1123_v28  ;;  %v2957_v56 = vsel %vm706_vm1, %v893_v35, %v897_v49 }
  0xde   : > { %v1243_v5 = vpop.permute.xlu1 %1242  ;;  %v1413_v55 = vsel %vm1395_vm6, %v1380_v26, %v2808_v18  ;;  %v1463_v38 = vsel %vm1461_vm8, %v1430_v9, %v1165_v47  ;;  %v1300_v47 = vsel %vm1296_vm3, %v2575_v40, %v2768_v60  ;;  %v797_v40 = vor.u32 %v796_v15, %v792_v32 }
  0xdf   : > { %1132 = vrot.lane.b32.xlu0 %v2855_v61, %s2412_s17  ;;  %v1446_v10 = vsel %vm1428_vm7, %v1413_v55, %v1139_v36  ;;  %v1496_v28 = vsel %vm1494_vm9, %v1463_v38, %v1227_v1  ;;  %v1333_v0 = vsel %vm1329_vm4, %v1300_v47, %v2781_v4  ;;  %v801_v60 = vrot.slane %v799_v39, 1 }
  0xe0   : > { %1148 = vrot.lane.b32.xlu1 %v2864_v19, %s2412_s17  ;;  %v1479_v18 = vsel %vm1461_vm8, %v1446_v10, %v1181_v50  ;;  %v1349_v1 = vsel %vm1329_vm4, %v1316_v57, %v2784_v6  ;;  %v1366_v3 = vsel %vm1362_vm5, %v1333_v0, %v2794_v11  ;;  %v954_v55 = vrot.slane %v2879_v59, 1 }
  0xe1   : > { %v1229_v23 = vpop.permute.xlu0 %1228  ;;  %v1512_v52 = vsel %vm1494_vm9, %v1479_v18, %v1243_v5  ;;  %v1382_v2 = vsel %vm1362_vm5, %v1349_v1, %v2796_v12  ;;  %v1399_v4 = vsel %vm1395_vm6, %v1366_v3, %v2814_v21  ;;  %v2951_v21 = vsel %vm706_vm1, %v797_v40, %v801_v60 }
  0xe2   : > { %v1245_v29 = vpop.permute.xlu1 %1244  ;;  %v1415_v31 = vsel %vm1395_vm6, %v1382_v2, %v2818_v24  ;;  %v1432_v6 = vsel %vm1428_vm7, %v1399_v4, %v2830_v42  ;;  %v978_v32 = vrot.slane %v2887_v25, 1  ;;  %v1073_v60 = vshrl.u32 %v3018_v44, 16 }
  0xe3   : > { %1172 = vrot.lane.b32.xlu0 %v2801_v13, %s2413_s26  ;;  %v1448_v11 = vsel %vm1428_vm7, %v1415_v31, %v2832_v45  ;;  %v1465_v12 = vsel %vm1461_vm8, %v1432_v6, %v2847_v53 }
  0xe4   : > { %1188 = vrot.lane.b32.xlu1 %v2806_v17, %s2413_s26  ;;  %v1481_v24 = vsel %vm1461_vm8, %v1448_v11, %v2850_v58  ;;  %v1498_v42 = vsel %vm1494_vm9, %v1465_v12, %v1229_v23  ;;  %v979_v59 = vsel %vm931_vm0, %v977_v30, %v978_v32 }
  0xe5   : > { %v1265_v43 = vpop.permute.xlu0 %1264  ;;  %v1514_v45 = vsel %vm1494_vm9, %v1481_v24, %v1245_v29  ;;  %v953_v29 = vrot.slane %v2858_v62, 1 }
  0xe6   : > { %v1281_v54 = vpop.permute.xlu1 %1280  ;;  %v1529_v36 = vsel %vm1527_vm10, %v1496_v28, %v1265_v43  ;;  %v3013_v28 = vld [vmem:[%s2560_s12 + $0x60] sm:$0xff]  }
  0xe7   : > { %1174 = vrot.lane.b32.xlu0 %v2858_v62, %s2413_s26  ;;  %2165 = vmatprep.mubr.msk.bf16.mxu0 %vm1587_vm11, %v1529_v36  ;;  %v1545_v50 = vsel %vm1527_vm10, %v1512_v52, %v1281_v54  ;;  %v955_v38 = vsel %vm931_vm0, %v953_v29, %v954_v55  ;;  %v2324_v52 = vld [vmem:[%s2560_s12 + $0x68] ss:$0 sps:$4 sm:$0x11]   ;;  %v1063_v54 = vshll.u32 %v3013_v28, 16  ;;  %v3072_v55 = vld [vmem:[%s2560_s12 + $0x6c] sm:$0xff]  }
  0xe8   : > { %1190 = vrot.lane.b32.xlu1 %v2867_v20, %s2413_s26  ;;  %2181 = vmatprep.mubr.msk.bf16.mxu1 %vm1587_vm11, %v1545_v50  ;;  %v1061_v50 = vshrl.u32 %v3013_v28, 16  ;;  %v1068_v0 = vshll.u32 %v2324_v52, 16 }
  0xe9   : > { %v2930_v5 = vpop.permute.xlu0 %903  ;;  %v1065_v57 = vrot.slane %v1063_v54, 1 }
  0xea   : > { %v2936_v22 = vpop.permute.xlu1 %919  ;;  %v1070_v2 = vrot.slane %v1068_v0, 1  ;;  %v3101_v0 = vld [vmem:[%s2560_s12 + $0xec] ss:$0 sps:$4 sm:$0x11]  }
  0xeb   : > { %1234 = vrot.lane.b32.xlu0 %v2837_v46, %s2414_s7  ;;  %v1066_v49 = vor.u32 %v1065_v57, %v1061_v50  ;;  %v1205_v50 = vshll.u32 %v3072_v55, 16 }
  0xec   : > { %1250 = vrot.lane.b32.xlu1 %v2840_v48, %s2414_s7 }
  0xed   : > { %v1267_v63 = vpop.permute.xlu0 %1266  ;;  %v3051_v12 = vsel %vm706_vm1, %v1066_v49, %v1070_v2 }
  0xee   : > { %v1283_v26 = vpop.permute.xlu1 %1282  ;;  %v1531_v53 = vsel %vm1527_vm10, %v1498_v42, %v1267_v63 }
  0xef   : > { %v1547_v27 = vsel %vm1527_vm10, %v1514_v45, %v1283_v26  ;;  %1236 = vrot.lane.b32.xlu0 %v2951_v21, %s2414_s7  ;;  %2166 = vmatmul.mubr.msk.bf16.vlgmr.msra.gmra.mrb[0].mxu0 %vm1587_vm11, %v1531_v53  ;;  %v1117_v45 = vrot.slane %v2324_v52, 1  ;;  %v1119_v26 = vrot.slane %v3018_v44, 1  ;;  %v3078_v52 = vld [vmem:[%s2560_s12 + $0xe4] sm:$0xff]  }
  0xf0   : > { %1252 = vrot.lane.b32.xlu1 %v2957_v56, %s2414_s7  ;;  %2182 = vmatmul.mubr.msk.bf16.vlgmr.msra.gmra.mrb[0].mxu1 %vm1587_vm11, %v1547_v27 }
  0xf1   : > { %v2968_v58 = vpop.permute.xlu0 %905 }
  0xf2   : > { %v2970_v23 = vpop.permute.xlu1 %921 }
  0xf3   : > { %1272 = vrot.lane.b32.xlu0 %v2855_v61, %s2415_s8 }
  0xf4   : > { %1288 = vrot.lane.b32.xlu1 %v2864_v19, %s2415_s8 }
  0xf5   : > { %v2978_v9 = vpop.permute.xlu0 %984 }
  0xf6   : > { %v2982_v10 = vpop.permute.xlu1 %1000 }
  0xf7   : > { %911 = vrot.lane.b32.xlu0 %v2837_v46, %s2409_s14 }
  0xf8   : > { %927 = vrot.lane.b32.xlu1 %v2840_v48, %s2409_s14 }
  0xf9   : > { %v2989_v15 = vpop.permute.xlu0 %986 }
  0xfa   : > { %v2992_v39 = vpop.permute.xlu1 %1002 }
  0xfb   : > { %1274 = vrot.lane.b32.xlu0 %v955_v38, %s2415_s8 }
  0xfc   : > { %1290 = vrot.lane.b32.xlu1 %v979_v59, %s2415_s8 }
  0xfd   : > { %v2996_v25 = vpop.permute.xlu0 %1026 }
  0xfe   : > { %v2998_v46 = vpop.permute.xlu1 %1042 }
  0xff   : > { %913 = vrot.lane.b32.xlu0 %v2951_v21, %s2409_s14 }
 0x100   : > { %929 = vrot.lane.b32.xlu1 %v2957_v56, %s2409_s14 }
 0x101   : > { %v3004_v48 = vpop.permute.xlu0 %1028 }
 0x102   : > { %v3006_v18 = vpop.permute.xlu1 %1044 }
 0x103   : > { %992 = vrot.lane.b32.xlu0 %v2855_v61, %s2408_s13  ;;  %v2323_v61 = vld [vmem:[%s2560_s12 + $0xe0] ss:$0 sps:$4 sm:$0x11]  }
 0x104   : > { %1008 = vrot.lane.b32.xlu1 %v2864_v19, %s2408_s13  ;;  %v1075_v19 = vshll.u32 %v3018_v44, 16  ;;  %v1080_v3 = vshll.u32 %v2323_v61, 16  ;;  %v1120_v53 = vrot.slane %v2323_v61, 1  ;;  %v1302_v61 = vsel %vm1296_vm3, %v2605_v14, %v2930_v5 }
 0x105   : > { %v3015_v43 = vpop.permute.xlu0 %1088 }
 0x106   : > { %v3020_v51 = vpop.permute.xlu1 %1104  ;;  %v1077_v1 = vrot.slane %v1075_v19, 1  ;;  %v1082_v6 = vrot.slane %v1080_v3, 1  ;;  %v3075_v32 = vsel %vm931_vm0, %v1119_v26, %v1120_v53  ;;  %v3093_v19 = vld [vmem:[%s2560_s12 + $0x74] ss:$0 sps:$4 sm:$0x11]   ;;  %v1203_v3 = vshrl.u32 %v3072_v55, 16 }
 0x107   : > { %994 = vrot.lane.b32.xlu0 %v955_v38, %s2408_s13  ;;  %v1210_v2 = vshll.u32 %v3093_v19, 16 }
 0x108   : > { %1010 = vrot.lane.b32.xlu1 %v979_v59, %s2408_s13  ;;  %v1078_v31 = vor.u32 %v1077_v1, %v1073_v60 }
 0x109   : > { %v3026_v36 = vpop.permute.xlu0 %1090 }
 0x10a   : > { %v3030_v47 = vpop.permute.xlu1 %1106  ;;  %v3054_v42 = vsel %vm706_vm1, %v1078_v31, %v1082_v6  ;;  %v1222_v6 = vshll.u32 %v3101_v0, 16 }
 0x10b   : > { %1034 = vrot.lane.b32.xlu0 %v2858_v62, %s2410_s15 }
 0x10c   : > { %1050 = vrot.lane.b32.xlu1 %v2867_v20, %s2410_s15 }
 0x10d   : > { %v1127_v40 = vpop.permute.xlu0 %1126 }
 0x10e   : > { %v1143_v35 = vpop.permute.xlu1 %1142 }
 0x10f   : > { %1036 = vrot.lane.b32.xlu0 %v3013_v28, %s2410_s15 }
 0x110   : > { %1052 = vrot.lane.b32.xlu1 %v3018_v44, %s2410_s15 }
 0x111   : > { %v3042_v4 = vpop.permute.xlu0 %1128 }
 0x112   : > { %v3044_v11 = vpop.permute.xlu1 %1144 }
 0x113   : > { %1096 = vrot.lane.b32.xlu0 %v2951_v21, %s2411_s16  ;;  %v1116_v21 = vrot.slane %v3013_v28, 1 }
 0x114   : > { %1112 = vrot.lane.b32.xlu1 %v2957_v56, %s2411_s16 }
 0x115   : > { %v1169_v24 = vpop.permute.xlu0 %1168  ;;  %v3069_v29 = vsel %vm931_vm0, %v1116_v21, %v1117_v45 }
 0x116   : > { %v1185_v63 = vpop.permute.xlu1 %1184 }
 0x117   : > { %1098 = vrot.lane.b32.xlu0 %v3051_v12, %s2411_s16 }
 0x118   : > { %1114 = vrot.lane.b32.xlu1 %v3054_v42, %s2411_s16 }
 0x119   : > { %v3061_v56 = vpop.permute.xlu0 %1170 }
 0x11a   : > { %v3064_v27 = vpop.permute.xlu1 %1186 }
 0x11b   : > { %1134 = vrot.lane.b32.xlu0 %v955_v38, %s2412_s17  ;;  %v1318_v38 = vsel %vm1296_vm3, %v2609_v16, %v2936_v22  ;;  %v1217_v16 = vshll.u32 %v3078_v52, 16 }
 0x11c   : > { %1150 = vrot.lane.b32.xlu1 %v979_v59, %s2412_s17  ;;  %v1335_v59 = vsel %vm1329_vm4, %v1302_v61, %v2978_v9  ;;  %v1351_v14 = vsel %vm1329_vm4, %v1318_v38, %v2982_v10  ;;  %v1224_v38 = vrot.slane %v1222_v6, 1 }
 0x11d   : > { %v1231_v30 = vpop.permute.xlu0 %1230  ;;  %v1368_v5 = vsel %vm1362_vm5, %v1335_v59, %v2996_v25  ;;  %v1384_v22 = vsel %vm1362_vm5, %v1351_v14, %v2998_v46  ;;  %v1215_v25 = vshrl.u32 %v3078_v52, 16 }
 0x11e   : > { %v1247_v54 = vpop.permute.xlu1 %1246  ;;  %v1401_v9 = vsel %vm1395_vm6, %v1368_v5, %v3015_v43  ;;  %v1417_v1 = vsel %vm1395_vm6, %v1384_v22, %v3020_v51  ;;  %v1207_v43 = vrot.slane %v1205_v50, 1  ;;  %v1262_v22 = vrot.slane %v3101_v0, 1 }
 0x11f   : > { %1136 = vrot.lane.b32.xlu0 %v3069_v29, %s2412_s17  ;;  %v1434_v10 = vsel %vm1428_vm7, %v1401_v9, %v1127_v40  ;;  %v1450_v49 = vsel %vm1428_vm7, %v1417_v1, %v1143_v35 }
 0x120   : > { %1152 = vrot.lane.b32.xlu1 %v3075_v32, %s2412_s17  ;;  %v1467_v46 = vsel %vm1461_vm8, %v1434_v10, %v1169_v24  ;;  %v1483_v51 = vsel %vm1461_vm8, %v1450_v49, %v1185_v63  ;;  %v1320_v63 = vsel %vm1296_vm3, %v2645_v41, %v2970_v23 }
 0x121   : > { %v1233_v57 = vpop.permute.xlu0 %1232  ;;  %v1500_v40 = vsel %vm1494_vm9, %v1467_v46, %v1231_v30  ;;  %v1516_v21 = vsel %vm1494_vm9, %v1483_v51, %v1247_v54  ;;  %v1353_v53 = vsel %vm1329_vm4, %v1320_v63, %v2992_v39 }
 0x122   : > { %v1249_v60 = vpop.permute.xlu1 %1248  ;;  %v1386_v41 = vsel %vm1362_vm5, %v1353_v53, %v3006_v18 }
 0x123   : > { %1176 = vrot.lane.b32.xlu0 %v3013_v28, %s2413_s26  ;;  %v1219_v28 = vrot.slane %v1217_v16, 1  ;;  %v1419_v59 = vsel %vm1395_vm6, %v1386_v41, %v3030_v47  ;;  %v1261_v16 = vrot.slane %v3078_v52, 1 }
 0x124   : > { %1192 = vrot.lane.b32.xlu1 %v3018_v44, %s2413_s26  ;;  %v1304_v44 = vsel %vm1296_vm3, %v2636_v34, %v2968_v58  ;;  %v1208_v34 = vor.u32 %v1207_v43, %v1203_v3  ;;  %v1212_v58 = vrot.slane %v1210_v2, 1  ;;  %v1452_v39 = vsel %vm1428_vm7, %v1419_v59, %v3044_v11 }
 0x125   : > { %v1269_v31 = vpop.permute.xlu0 %1268  ;;  %v1337_v26 = vsel %vm1329_vm4, %v1304_v44, %v2989_v15  ;;  %v1220_v61 = vor.u32 %v1219_v28, %v1215_v25  ;;  %v1263_v10 = vsel %vm931_vm0, %v1261_v16, %v1262_v22 }
 0x126   : > { %v1285_v45 = vpop.permute.xlu1 %1284  ;;  %v1533_v35 = vsel %vm1527_vm10, %v1500_v40, %v1269_v31  ;;  %v1370_v30 = vsel %vm1362_vm5, %v1337_v26, %v3004_v48  ;;  %v1213_v18 = vsel %vm706_vm1, %v1208_v34, %v1212_v58 }
 0x127   : > { %v1549_v24 = vsel %vm1527_vm10, %v1516_v21, %v1285_v45  ;;  %1178 = vrot.lane.b32.xlu0 %v3072_v55, %s2413_s26  ;;  %2169 = vmatprep.mubr.msk.bf16.mxu0 %vm1587_vm11, %v1533_v35  ;;  %v1403_v23 = vsel %vm1395_vm6, %v1370_v30, %v3026_v36  ;;  %v1485_v36 = vsel %vm1461_vm8, %v1452_v39, %v3064_v27  ;;  %v1259_v27 = vrot.slane %v3093_v19, 1 }
 0x128   : > { %1194 = vrot.lane.b32.xlu1 %v3078_v52, %s2413_s26  ;;  %2185 = vmatprep.mubr.msk.bf16.mxu1 %vm1587_vm11, %v1549_v24  ;;  %v1436_v50 = vsel %vm1428_vm7, %v1403_v23, %v3042_v4  ;;  %v1225_v14 = vsel %vm706_vm1, %v1220_v61, %v1224_v38 }
 0x129   : > { %v908_v54 = vpop.permute.xlu0 %907  ;;  %v1469_v48 = vsel %vm1461_vm8, %v1436_v50, %v3061_v56 }
 0x12a   : > { %v924_v15 = vpop.permute.xlu1 %923  ;;  %v1502_v47 = vsel %vm1494_vm9, %v1469_v48, %v1233_v57  ;;  %v1306_v24 = vsel %vm1296_vm3, %v2701_v7, %v908_v54 }
 0x12b   : > { %1238 = vrot.lane.b32.xlu0 %v3051_v12, %s2414_s7  ;;  %v1518_v12 = vsel %vm1494_vm9, %v1485_v36, %v1249_v60  ;;  %v1322_v63 = vsel %vm1296_vm3, %v2704_v8, %v924_v15 }
 0x12c   : > { %1254 = vrot.lane.b32.xlu1 %v3054_v42, %s2414_s7  ;;  %v1258_v42 = vrot.slane %v3072_v55, 1 }
 0x12d   : > { %v1271_v4 = vpop.permute.xlu0 %1270 }
 0x12e   : > { %v1287_v5 = vpop.permute.xlu1 %1286  ;;  %v1535_v11 = vsel %vm1527_vm10, %v1502_v47, %v1271_v4  ;;  %v1260_v60 = vsel %vm931_vm0, %v1258_v42, %v1259_v27 }
 0x12f   : > { %v1551_v56 = vsel %vm1527_vm10, %v1518_v12, %v1287_v5  ;;  %1240 = vrot.lane.b32.xlu0 %v1213_v18, %s2414_s7  ;;  %2170 = vmatmul.mubr.msk.bf16.gmra.mrb[4].mxu0 %vm1587_vm11, %v1535_v11 }
 0x130   : > { %1256 = vrot.lane.b32.xlu1 %v1225_v14, %s2414_s7  ;;  %2186 = vmatmul.mubr.msk.bf16.gmra.mrb[4].mxu1 %vm1587_vm11, %v1551_v56 }
 0x131   : > { %v910_v57 = vpop.permute.xlu0 %909 }
 0x132   : > { %v926_v9 = vpop.permute.xlu1 %925  ;;  %v1308_v18 = vsel %vm1296_vm3, %v2734_v33, %v910_v57 }
 0x133   : > { %1276 = vrot.lane.b32.xlu0 %v3069_v29, %s2415_s8  ;;  %v1324_v47 = vsel %vm1296_vm3, %v2738_v37, %v926_v9 }
 0x134   : > { %1292 = vrot.lane.b32.xlu1 %v3075_v32, %s2415_s8 }
 0x135   : > { %v989_v1 = vpop.permute.xlu0 %988 }
 0x136   : > { %v1005_v55 = vpop.permute.xlu1 %1004  ;;  %v1339_v26 = vsel %vm1329_vm4, %v1306_v24, %v989_v1 }
 0x137   : > { %1278 = vrot.lane.b32.xlu0 %v1260_v60, %s2415_s8  ;;  %v1355_v34 = vsel %vm1329_vm4, %v1322_v63, %v1005_v55 }
 0x138   : > { %1294 = vrot.lane.b32.xlu1 %v1263_v10, %s2415_s8 }
 0x139   : > { %v991_v52 = vpop.permute.xlu0 %990 }
 0x13a   : > { %v1007_v19 = vpop.permute.xlu1 %1006  ;;  %v1341_v4 = vsel %vm1329_vm4, %v1308_v18, %v991_v52 }
 0x13b   : > { %v1357_v14 = vsel %vm1329_vm4, %v1324_v47, %v1007_v19 }
 0x13d   : > { %v1031_v0 = vpop.permute.xlu0 %1030 }
 0x13e   : > { %v1047_v25 = vpop.permute.xlu1 %1046  ;;  %v1372_v58 = vsel %vm1362_vm5, %v1339_v26, %v1031_v0 }
 0x13f   : > { %v1388_v30 = vsel %vm1362_vm5, %v1355_v34, %v1047_v25 }
 0x141   : > { %v1033_v3 = vpop.permute.xlu0 %1032 }
 0x142   : > { %v1049_v49 = vpop.permute.xlu1 %1048  ;;  %v1374_v12 = vsel %vm1362_vm5, %v1341_v4, %v1033_v3 }
 0x143   : > { %v1390_v11 = vsel %vm1362_vm5, %v1357_v14, %v1049_v49 }
 0x145   : > { %v1093_v29 = vpop.permute.xlu0 %1092 }
 0x146   : > { %v1109_v46 = vpop.permute.xlu1 %1108  ;;  %v1405_v61 = vsel %vm1395_vm6, %v1372_v58, %v1093_v29 }
 0x147   : > { %v1421_v41 = vsel %vm1395_vm6, %v1388_v30, %v1109_v46 }
 0x149   : > { %v1095_v43 = vpop.permute.xlu0 %1094 }
 0x14a   : > { %v1111_v32 = vpop.permute.xlu1 %1110  ;;  %v1407_v33 = vsel %vm1395_vm6, %v1374_v12, %v1095_v43 }
 0x14b   : > { %v1423_v42 = vsel %vm1395_vm6, %v1390_v11, %v1111_v32 }
 0x14d   : > { %v1131_v2 = vpop.permute.xlu0 %1130 }
 0x14e   : > { %v1147_v51 = vpop.permute.xlu1 %1146  ;;  %v1438_v23 = vsel %vm1428_vm7, %v1405_v61, %v1131_v2 }
 0x14f   : > { %v1454_v7 = vsel %vm1428_vm7, %v1421_v41, %v1147_v51 }
 0x151   : > { %v1133_v40 = vpop.permute.xlu0 %1132 }
 0x152   : > { %v1149_v31 = vpop.permute.xlu1 %1148  ;;  %v1440_v27 = vsel %vm1428_vm7, %v1407_v33, %v1133_v40 }
 0x153   : > { %v1456_v37 = vsel %vm1428_vm7, %v1423_v42, %v1149_v31 }
 0x155   : > { %v1173_v28 = vpop.permute.xlu0 %1172 }
 0x156   : > { %v1189_v6 = vpop.permute.xlu1 %1188  ;;  %v1471_v8 = vsel %vm1461_vm8, %v1438_v23, %v1173_v28 }
 0x157   : > { %v1487_v54 = vsel %vm1461_vm8, %v1454_v7, %v1189_v6 }
 0x159   : > { %v1175_v21 = vpop.permute.xlu0 %1174 }
 0x15a   : > { %v1191_v45 = vpop.permute.xlu1 %1190  ;;  %v1473_v57 = vsel %vm1461_vm8, %v1440_v27, %v1175_v21 }
 0x15b   : > { %v1489_v16 = vsel %vm1461_vm8, %v1456_v37, %v1191_v45 }
 0x15d   : > { %v1235_v35 = vpop.permute.xlu0 %1234 }
 0x15e   : > { %v1251_v44 = vpop.permute.xlu1 %1250  ;;  %v1504_v15 = vsel %vm1494_vm9, %v1471_v8, %v1235_v35 }
 0x15f   : > { %v1520_v50 = vsel %vm1494_vm9, %v1487_v54, %v1251_v44 }
 0x161   : > { %v1237_v53 = vpop.permute.xlu0 %1236 }
 0x162   : > { %v1253_v38 = vpop.permute.xlu1 %1252  ;;  %v1506_v22 = vsel %vm1494_vm9, %v1473_v57, %v1237_v53 }
 0x163   : > { %v1522_v60 = vsel %vm1494_vm9, %v1489_v16, %v1253_v38 }
 0x165   : > { %v1273_v59 = vpop.permute.xlu0 %1272 }
 0x166   : > { %v1289_v39 = vpop.permute.xlu1 %1288  ;;  %v1537_v48 = vsel %vm1527_vm10, %v1504_v15, %v1273_v59 }
 0x167   : > { %v1553_v36 = vsel %vm1527_vm10, %v1520_v50, %v1289_v39  ;;  %2173 = vmatprep.mubr.msk.bf16.mxu0 %vm1587_vm11, %v1537_v48 }
 0x168   : > { %2189 = vmatprep.mubr.msk.bf16.mxu1 %vm1587_vm11, %v1553_v36 }
 0x169   : > { %v912_v5 = vpop.permute.xlu0 %911 }
 0x16a   : > { %v928_v56 = vpop.permute.xlu1 %927  ;;  %v1310_v58 = vsel %vm1296_vm3, %v2801_v13, %v912_v5 }
 0x16b   : > { %v1326_v53 = vsel %vm1296_vm3, %v2806_v17, %v928_v56 }
 0x16d   : > { %v1275_v9 = vpop.permute.xlu0 %1274 }
 0x16e   : > { %v1291_v1 = vpop.permute.xlu1 %1290  ;;  %v1539_v10 = vsel %vm1527_vm10, %v1506_v22, %v1275_v9 }
 0x16f   : > { %v1555_v55 = vsel %vm1527_vm10, %v1522_v60, %v1291_v1  ;;  %2174 = vmatmul.mubr.msk.bf16.gmra.mrb[8].mxu0 %vm1587_vm11, %v1539_v10  ;;  %v3267_v10 = vld [vmem:[%s3374_s2] ss:$0 sm:$0xff] }
 0x170   : > { %2190 = vmatmul.mubr.msk.bf16.gmra.mrb[8].mxu1 %vm1587_vm11, %v1555_v55 }
 0x171   : > { %v914_v52 = vpop.permute.xlu0 %913 }
 0x172   : > { %v930_v19 = vpop.permute.xlu1 %929  ;;  %v1312_v54 = vsel %vm1296_vm3, %v2858_v62, %v914_v52 }
 0x173   : > { %v1328_v17 = vsel %vm1296_vm3, %v2867_v20, %v930_v19 }
 0x175   : > { %v993_v0 = vpop.permute.xlu0 %992 }
 0x176   : > { %v1009_v25 = vpop.permute.xlu1 %1008  ;;  %v1343_v30 = vsel %vm1329_vm4, %v1310_v58, %v993_v0 }
 0x177   : > { %v1359_v61 = vsel %vm1329_vm4, %v1326_v53, %v1009_v25 }
 0x179   : > { %v995_v3 = vpop.permute.xlu0 %994 }
 0x17a   : > { %v1011_v49 = vpop.permute.xlu1 %1010  ;;  %v1345_v59 = vsel %vm1329_vm4, %v1312_v54, %v995_v3 }
 0x17b   : > { %v1361_v48 = vsel %vm1329_vm4, %v1328_v17, %v1011_v49 }
 0x17d   : > { %v1035_v29 = vpop.permute.xlu0 %1034 }
 0x17e   : > { %v1051_v46 = vpop.permute.xlu1 %1050  ;;  %v1376_v38 = vsel %vm1362_vm5, %v1343_v30, %v1035_v29 }
 0x17f   : > { %v1392_v23 = vsel %vm1362_vm5, %v1359_v61, %v1051_v46 }
 0x181   : > { %v1037_v43 = vpop.permute.xlu0 %1036 }
 0x182   : > { %v1053_v32 = vpop.permute.xlu1 %1052  ;;  %v1378_v18 = vsel %vm1362_vm5, %v1345_v59, %v1037_v43 }
 0x183   : > { %v1394_v4 = vsel %vm1362_vm5, %v1361_v48, %v1053_v32 }
 0x185   : > { %v1097_v2 = vpop.permute.xlu0 %1096 }
 0x186   : > { %v1113_v51 = vpop.permute.xlu1 %1112  ;;  %v1409_v7 = vsel %vm1395_vm6, %v1376_v38, %v1097_v2 }
 0x187   : > { %v1425_v13 = vsel %vm1395_vm6, %v1392_v23, %v1113_v51 }
 0x189   : > { %v1099_v40 = vpop.permute.xlu0 %1098 }
 0x18a   : > { %v1115_v31 = vpop.permute.xlu1 %1114  ;;  %v1411_v14 = vsel %vm1395_vm6, %v1378_v18, %v1099_v40 }
 0x18b   : > { %v1427_v11 = vsel %vm1395_vm6, %v1394_v4, %v1115_v31 }
 0x18d   : > { %v1135_v28 = vpop.permute.xlu0 %1134 }
 0x18e   : > { %v1151_v6 = vpop.permute.xlu1 %1150  ;;  %v1442_v15 = vsel %vm1428_vm7, %v1409_v7, %v1135_v28 }
 0x18f   : > { %v1458_v50 = vsel %vm1428_vm7, %v1425_v13, %v1151_v6 }
 0x191   : > { %v1137_v21 = vpop.permute.xlu0 %1136 }
 0x192   : > { %v1153_v45 = vpop.permute.xlu1 %1152  ;;  %v1444_v33 = vsel %vm1428_vm7, %v1411_v14, %v1137_v21 }
 0x193   : > { %v1460_v42 = vsel %vm1428_vm7, %v1427_v11, %v1153_v45 }
 0x195   : > { %v1177_v35 = vpop.permute.xlu0 %1176 }
 0x196   : > { %v1193_v44 = vpop.permute.xlu1 %1192  ;;  %v1475_v39 = vsel %vm1461_vm8, %v1442_v15, %v1177_v35 }
 0x197   : > { %v1491_v36 = vsel %vm1461_vm8, %v1458_v50, %v1193_v44 }
 0x199   : > { %v1179_v24 = vpop.permute.xlu0 %1178 }
 0x19a   : > { %v1195_v63 = vpop.permute.xlu1 %1194  ;;  %v1477_v27 = vsel %vm1461_vm8, %v1444_v33, %v1179_v24 }
 0x19b   : > { %v1493_v37 = vsel %vm1461_vm8, %v1460_v42, %v1195_v63 }
 0x19d   : > { %v1239_v26 = vpop.permute.xlu0 %1238 }
 0x19e   : > { %v1255_v34 = vpop.permute.xlu1 %1254  ;;  %v1508_v62 = vsel %vm1494_vm9, %v1475_v39, %v1239_v26 }
 0x19f   : > { %v1524_v20 = vsel %vm1494_vm9, %v1491_v36, %v1255_v34 }
 0x1a1   : > { %v1241_v41 = vpop.permute.xlu0 %1240 }
 0x1a2   : > { %v1257_v8 = vpop.permute.xlu1 %1256  ;;  %v1510_v57 = vsel %vm1494_vm9, %v1477_v27, %v1241_v41 }
 0x1a3   : > { %v1526_v22 = vsel %vm1494_vm9, %v1493_v37, %v1257_v8 }
 0x1a5   : > { %v1277_v47 = vpop.permute.xlu0 %1276 }
 0x1a6   : > { %v1293_v12 = vpop.permute.xlu1 %1292  ;;  %v1541_v5 = vsel %vm1527_vm10, %v1508_v62, %v1277_v47 }
 0x1a7   : > { %v1557_v56 = vsel %vm1527_vm10, %v1524_v20, %v1293_v12  ;;  %2177 = vmatprep.mubr.msk.bf16.mxu0 %vm1587_vm11, %v1541_v5 }
 0x1a8   : > { %2193 = vmatprep.mubr.msk.bf16.mxu1 %vm1587_vm11, %v1557_v56 }
 0x1a9   : > { %v1279_v16 = vpop.permute.xlu0 %1278 }
 0x1aa   : > { %v1295_v9 = vpop.permute.xlu1 %1294  ;;  %v1543_v60 = vsel %vm1527_vm10, %v1510_v57, %v1279_v16 }
 0x1ab   : > { %v1559_v1 = vsel %vm1527_vm10, %v1526_v22, %v1295_v9  ;;  %2178 = vmatmul.mubr.msk.bf16.gmra.mrb[12].mxu0 %vm1587_vm11, %v1543_v60 }
 0x1ac   : > { %2194 = vmatmul.mubr.msk.bf16.gmra.mrb[12].mxu1 %vm1587_vm11, %v1559_v1 }
 0x1c2   : > { %v2167_v55 = vpop.f32.mrb[0].mxu0 }
 0x1c3   : > { %v2183_v52 = vpop.f32.mrb[0].mxu1  ;;  %v1658_v19 = vpop.f32.mrb[1].mxu0  ;;  %v1667_v43 = vadd.f32 %v2167_v55, %v3267_v10 }
 0x1c4   : > { %v1659_v0 = vadd.f32 %v3267_v10, %v1658_v19  ;;  %v1722_v25 = vpop.f32.mrb[1].mxu1  ;;  %v2168_v3 = vpop.f32.mrb[2].mxu0  ;;  %v1731_v51 = vadd.f32 %v2183_v52, %v3267_v10 }
 0x1c5   : > { %v1723_v49 = vadd.f32 %v3267_v10, %v1722_v25  ;;  %v2184_v29 = vpop.f32.mrb[2].mxu1  ;;  %v1661_v46 = vpop.f32.mrb[3].mxu0  ;;  %v1670_v28 = vadd.f32 %v2168_v3, %v3267_v10  ;;  %v1787_v44 = vmax.f32 %v1667_v43, 0.0 }
 0x1c6   : > { %v1662_v32 = vadd.f32 %v3267_v10, %v1661_v46  ;;  %v1725_v2 = vpop.f32.mrb[3].mxu1  ;;  %v1785_v31 = vmax.f32 %v1659_v0, 0.0  ;;  %v1734_v45 = vadd.f32 %v2184_v29, %v3267_v10  ;;  %v1803_v63 = vmax.f32 %v1731_v51, 0.0 }
 0x1c7   : > { %v1726_v40 = vadd.f32 %v3267_v10, %v1725_v2  ;;  %v1801_v21 = vmax.f32 %v1723_v49, 0.0  ;;  %v1788_v34 = vmax.f32 %v1670_v28, 0.0 }
 0x1c8   : > { %v1786_v6 = vmax.f32 %v1662_v32, 0.0  ;;  %v1804_v53 = vmax.f32 %v1734_v45, 0.0 }
 0x1c9   : > { %v1802_v35 = vmax.f32 %v1726_v40, 0.0 }
 0x1ca   : > { %v1817_v24 = vadd.f32 %v1786_v6, %v1785_v31 }
 0x1cb   : > { %v1838_v26 = vadd.f32 %v1802_v35, %v1801_v21 }
 0x1cc   : > { %v1818_v58 = vadd.f32 %v1817_v24, %v1787_v44 }
 0x1cd   : > { %v1839_v30 = vadd.f32 %v1838_v26, %v1803_v63 }
 0x1ce   : > { %v1819_v61 = vadd.f32 %v1818_v58, %v1788_v34 }
 0x1cf   : > { %v1840_v38 = vadd.f32 %v1839_v30, %v1804_v53 }
 0x202   : > { %v2171_v41 = vpop.f32.mrb[4].mxu0 }
 0x203   : > { %v2187_v23 = vpop.f32.mrb[4].mxu1  ;;  %v1674_v7 = vpop.f32.mrb[5].mxu0  ;;  %v1683_v50 = vadd.f32 %v2171_v41, %v3267_v10 }
 0x204   : > { %v1675_v8 = vadd.f32 %v3267_v10, %v1674_v7  ;;  %v1738_v54 = vpop.f32.mrb[5].mxu1  ;;  %v2172_v13 = vpop.f32.mrb[6].mxu0  ;;  %v1747_v36 = vadd.f32 %v2187_v23, %v3267_v10 }
 0x205   : > { %v1739_v15 = vadd.f32 %v3267_v10, %v1738_v54  ;;  %v2188_v17 = vpop.f32.mrb[6].mxu1  ;;  %v1677_v59 = vpop.f32.mrb[7].mxu0  ;;  %v1686_v14 = vadd.f32 %v2172_v13, %v3267_v10  ;;  %v1791_v33 = vmax.f32 %v1683_v50, 0.0 }
 0x206   : > { %v1789_v39 = vmax.f32 %v1675_v8, 0.0  ;;  %v1678_v48 = vadd.f32 %v3267_v10, %v1677_v59  ;;  %v1741_v18 = vpop.f32.mrb[7].mxu1  ;;  %v1750_v5 = vadd.f32 %v2188_v17, %v3267_v10  ;;  %v1807_v42 = vmax.f32 %v1747_v36, 0.0 }
 0x207   : > { %v1805_v62 = vmax.f32 %v1739_v15, 0.0  ;;  %v1742_v47 = vadd.f32 %v3267_v10, %v1741_v18  ;;  %v1792_v37 = vmax.f32 %v1686_v14, 0.0 }
 0x208   : > { %v1820_v4 = vadd.f32 %v1819_v61, %v1789_v39  ;;  %v1790_v20 = vmax.f32 %v1678_v48, 0.0  ;;  %v1808_v16 = vmax.f32 %v1750_v5, 0.0 }
 0x209   : > { %v1841_v12 = vadd.f32 %v1840_v38, %v1805_v62  ;;  %v1806_v11 = vmax.f32 %v1742_v47, 0.0 }
 0x20a   : > { %v1821_v56 = vadd.f32 %v1820_v4, %v1790_v20 }
 0x20b   : > { %v1842_v27 = vadd.f32 %v1841_v12, %v1806_v11 }
 0x20c   : > { %v1822_v57 = vadd.f32 %v1821_v56, %v1791_v33 }
 0x20d   : > { %v1843_v22 = vadd.f32 %v1842_v27, %v1807_v42 }
 0x20e   : > { %v1823_v9 = vadd.f32 %v1822_v57, %v1792_v37 }
 0x20f   : > { %v1844_v60 = vadd.f32 %v1843_v22, %v1808_v16 }
 0x242   : > { %v2175_v1 = vpop.f32.mrb[8].mxu0 }
 0x243   : > { %v2191_v55 = vpop.f32.mrb[8].mxu1  ;;  %v1690_v52 = vpop.f32.mrb[9].mxu0  ;;  %v1699_v46 = vadd.f32 %v2175_v1, %v3267_v10 }
 0x244   : > { %v1691_v19 = vadd.f32 %v3267_v10, %v1690_v52  ;;  %v1754_v0 = vpop.f32.mrb[9].mxu1  ;;  %v2176_v25 = vpop.f32.mrb[10].mxu0  ;;  %v1763_v51 = vadd.f32 %v2191_v55, %v3267_v10 }
 0x245   : > { %v1755_v3 = vadd.f32 %v3267_v10, %v1754_v0  ;;  %v2192_v49 = vpop.f32.mrb[10].mxu1  ;;  %v1693_v29 = vpop.f32.mrb[11].mxu0  ;;  %v1702_v6 = vadd.f32 %v2176_v25, %v3267_v10  ;;  %v1795_v24 = vmax.f32 %v1699_v46, 0.0 }
 0x246   : > { %v1793_v43 = vmax.f32 %v1691_v19, 0.0  ;;  %v1694_v32 = vadd.f32 %v3267_v10, %v1693_v29  ;;  %v1757_v2 = vpop.f32.mrb[11].mxu1  ;;  %v1766_v35 = vadd.f32 %v2192_v49, %v3267_v10  ;;  %v1811_v26 = vmax.f32 %v1763_v51, 0.0 }
 0x247   : > { %v1809_v40 = vmax.f32 %v1755_v3, 0.0  ;;  %v1758_v31 = vadd.f32 %v3267_v10, %v1757_v2  ;;  %v1796_v58 = vmax.f32 %v1702_v6, 0.0  ;;  %v1861_v2 = vld [vmem:[#allocation2] sm:$0x3]  ;;  %v2330_v6 = vld [vmem:[%s3375_s3 + $0x8] sm:$0xff] (!%p2117_p10)  }
 0x248   : > { %v1824_v28 = vadd.f32 %v1823_v9, %v1793_v43  ;;  %v1794_v21 = vmax.f32 %v1694_v32, 0.0  ;;  %v1812_v30 = vmax.f32 %v1766_v35, 0.0  ;;  %v2333_v35 = vld [vmem:[%s3375_s3 + $0x20] sm:$0xff] (!%p2117_p10)  }
 0x249   : > { %v1845_v45 = vadd.f32 %v1844_v60, %v1809_v40  ;;  %v1810_v44 = vmax.f32 %v1758_v31, 0.0  ;;  %v2329_v31 = vld [vmem:[%s3375_s3] sm:$0xff] (!%p2117_p10)  }
 0x24a   : > { %v1825_v63 = vadd.f32 %v1824_v28, %v1794_v21  ;;  %v2416_v28 = vmov (!%p2117_p10), 0.0   ;;  %v2331_v21 = vld [vmem:[%s3375_s3 + $0x10] sm:$0xff] (!%p2117_p10)  }
 0x24b   : > { %v1846_v34 = vadd.f32 %v1845_v45, %v1810_v44  ;;  %2197 = vmatprep.subr.bf16.mxu0 (!%p2117_p10), %v2416_v28  ;;  %2213 = vmatprep.mubr.msk.bf16.mxu0 (!%p2117_p10), %vm2417_vm13, %v2416_v28  ;;  %v2332_v45 = vld [vmem:[%s3375_s3 + $0x18] sm:$0xff] (!%p2117_p10)   ;;  %v2334_v44 = vld [vmem:[%s3375_s3 + $0x28] sm:$0xff] (!%p2117_p10)  }
 0x24c   : > { %v1826_v53 = vadd.f32 %v1825_v63, %v1795_v24  ;;  %2198 = vmatpush3.bf16.msra.mxu0 (!%p2117_p10), %v2329_v31  ;;  %v2335_v24 = vld [vmem:[%s3375_s3 + $0x30] sm:$0xff] (!%p2117_p10)  }
 0x24d   : > { %v1847_v61 = vadd.f32 %v1846_v34, %v1811_v26  ;;  %2199 = vmatprep.subr.bf16.mxu0 (!%p2117_p10), %v2416_v28  ;;  %v2336_v34 = vld [vmem:[%s3375_s3 + $0x38] sm:$0xff] (!%p2117_p10)  }
 0x24e   : > { %v1827_v38 = vadd.f32 %v1826_v53, %v1796_v58  ;;  %v2118_v53 = vld [vmem:[%s3376_s4] ss:$0 sm:$0xff] (!%p2117_p10) }
 0x24f   : > { %v1848_v41 = vadd.f32 %v1847_v61, %v1812_v30 }
 0x250   : > { %2200 = vmatpush3.bf16.msra.mxu0 (!%p2117_p10), %v2330_v6 }
 0x251   : > { %2201 = vmatprep.subr.bf16.mxu0 (!%p2117_p10), %v2416_v28 }
 0x254   : > { %2202 = vmatpush3.bf16.msra.mxu0 (!%p2117_p10), %v2331_v21 }
 0x255   : > { %2203 = vmatprep.subr.bf16.mxu0 (!%p2117_p10), %v2416_v28 }
 0x258   : > { %2204 = vmatpush3.bf16.msra.mxu0 (!%p2117_p10), %v2332_v45 }
 0x259   : > { %2205 = vmatprep.subr.bf16.mxu0 (!%p2117_p10), %v2416_v28 }
 0x25c   : > { %2206 = vmatpush3.bf16.msra.mxu0 (!%p2117_p10), %v2333_v35 }
 0x25d   : > { %2207 = vmatprep.subr.bf16.mxu0 (!%p2117_p10), %v2416_v28 }
 0x260   : > { %2208 = vmatpush3.bf16.msra.mxu0 (!%p2117_p10), %v2334_v44 }
 0x261   : > { %2209 = vmatprep.subr.bf16.mxu0 (!%p2117_p10), %v2416_v28 }
 0x264   : > { %2210 = vmatpush3.bf16.msra.mxu0 (!%p2117_p10), %v2335_v24 }
 0x265   : > { %2211 = vmatprep.subr.bf16.mxu0 (!%p2117_p10), %v2416_v28 }
 0x268   : > { %2212 = vmatpush3.bf16.msra.mxu0 (!%p2117_p10), %v2336_v34 }
 0x27e   : > { %v2179_v23 = vpop.f32.mrb[12].mxu0 }
 0x27f   : > { %v2195_v7 = vpop.f32.mrb[12].mxu1  ;;  %v1706_v8 = vpop.f32.mrb[13].mxu0  ;;  %v1715_v39 = vadd.f32 %v2179_v23, %v3267_v10 }
 0x280   : > { %v1707_v54 = vadd.f32 %v3267_v10, %v1706_v8  ;;  %v1770_v13 = vpop.f32.mrb[13].mxu1  ;;  %v2180_v15 = vpop.f32.mrb[14].mxu0  ;;  %v1779_v62 = vadd.f32 %v2195_v7, %v3267_v10 }
 0x281   : > { %v1771_v17 = vadd.f32 %v3267_v10, %v1770_v13  ;;  %v2196_v59 = vpop.f32.mrb[14].mxu1  ;;  %v1709_v50 = vpop.f32.mrb[15].mxu0  ;;  %v1718_v20 = vadd.f32 %v2180_v15, %v3267_v10  ;;  %v1799_v56 = vmax.f32 %v1715_v39, 0.0 }
 0x282   : > { %v1797_v48 = vmax.f32 %v1707_v54, 0.0  ;;  %v1710_v18 = vadd.f32 %v3267_v10, %v1709_v50  ;;  %v1773_v36 = vpop.f32.mrb[15].mxu1  ;;  %v1782_v11 = vadd.f32 %v2196_v59, %v3267_v10  ;;  %v1815_v27 = vmax.f32 %v1779_v62, 0.0 }
 0x283   : > { %v1813_v47 = vmax.f32 %v1771_v17, 0.0  ;;  %v1774_v4 = vadd.f32 %v3267_v10, %v1773_v36  ;;  %v1800_v57 = vmax.f32 %v1718_v20, 0.0 }
 0x284   : > { %v1828_v14 = vadd.f32 %v1827_v38, %v1797_v48  ;;  %v1798_v12 = vmax.f32 %v1710_v18, 0.0  ;;  %v1816_v22 = vmax.f32 %v1782_v11, 0.0 }
 0x285   : > { %v1849_v5 = vadd.f32 %v1848_v41, %v1813_v47  ;;  %v1814_v33 = vmax.f32 %v1774_v4, 0.0 }
 0x286   : > { %v1829_v42 = vadd.f32 %v1828_v14, %v1798_v12 }
 0x287   : > { %v1850_v37 = vadd.f32 %v1849_v5, %v1814_v33 }
 0x288   : > { %v1830_v16 = vadd.f32 %v1829_v42, %v1799_v56 }
 0x289   : > { %v1851_v9 = vadd.f32 %v1850_v37, %v1815_v27 }
 0x28a   : > { %v1831_v60 = vadd.f32 %v1830_v16, %v1800_v57 }
 0x28b   : > { %v1852_v1 = vadd.f32 %v1851_v9, %v1816_v22 }
 0x28c   : > { %v1832_v55 = vrot.slane %v1831_v60, 4 }
 0x28d   : > { %v1853_v52 = vrot.slane %v1852_v1, 4 }
 0x28e   : > { %v1833_v19 = vadd.f32 %v1832_v55, %v1831_v60 }
 0x28f   : > { %v1854_v0 = vadd.f32 %v1853_v52, %v1852_v1 }
 0x290   : > { %v1834_v25 = vrot.slane %v1833_v19, 2 }
 0x291   : > { %v1855_v3 = vrot.slane %v1854_v0, 2 }
 0x292   : > { %v1835_v49 = vadd.f32 %v1834_v25, %v1833_v19 }
 0x293   : > { %v1856_v29 = vadd.f32 %v1855_v3, %v1854_v0 }
 0x294   : > { %v1836_v10 = vrot.slane %v1835_v49, 1 }
 0x295   : > { %v1857_v46 = vrot.slane %v1856_v29, 1 }
 0x296   : > { %v1837_v43 = vadd.f32 %v1836_v10, %v1835_v49  ;;  %1867 = sbr.rel (%p2117_p10) target bundleno = 895 (0x37f), region = 89 }
 0x297   : > { %v1858_v32 = vadd.f32 %v1857_v46, %v1856_v29 }
 0x299   : > { %v1860_v51 = vsel %vm1859_vm12, %v1837_v43, %v1858_v32 }
 0x29a   : > { %v1862_v40 = vadd.f32 %v1861_v2, %v1860_v51 }
 0x29c   : > { %1863 = vst [vmem:[#allocation2] sm:$0x3] %v1862_v40 }
 0x2a3   : > { %v1868_v63 = vld [vmem:[#allocation2] sm:$0x3] }
 0x2a4   : > { %v1869_v26 = vmul.f32 0.00390625, %v1868_v63 }
 0x2a6   : > { %v1870_v58 = vpack.c.bf16 %v1869_v26, %v1869_v26 }
 0x2a8   : > { %2214 = vmatmul.mubr.bf16.vlgmr.msra.gmra.mrb[0].mxu0 %v1870_v58 }
 0x37b   : > { %v1976_v30 = vpop.f32.mrb[0].mxu0 }
 0x37c   : > { %v1977_v61 = vadd.f32 %v2118_v53, %v1976_v30  ;;  %v2215_v38 = vpop.f32.mrb[1].mxu0 }
 0x37d   : > { %v1979_v41 = vpop.f32.mrb[2].mxu0 }
 0x37e   : > { %1982 = vst [vmem:[#allocation4] sm:$0x3] %v1977_v61  ;;  %v2216_v23 = vpop.f32.mrb[3].mxu0 }
 0x37f PF: > { %p3331_p11 = scmp.eq.s32.totalorder %s2051_s23, 1  ;;  %s2418_s11 = smov [#allocation4]  }
 0x380   : > { %s1992_s12 = sshll.u32 %s2418_s11, 4  ;;  %s1993_s12 = int_to_ptr.vmem [resolvable:$true] %s1992_s12 }
 0x381   : > { %s2337_s13 = scalar_lea.vmem %s1993_s12, 32  ;;  %p2344_p1 = scmp.lt.s32.totalorder %s1993_s12, %s1993_s12 }
 0x382   : > { %p2338_p12 = scmp.ne.s32.totalorder %s1993_s12, %s2337_s13  ;;  %p2345_p2 = scmp.lt.s32.totalorder %s2337_s13, %s2337_s13 }
 0x384   : > { %p2339_p13 = pnand %p2338_p12, %p3331_p11  ;;  %p2346_p3 = por %p2345_p2, %p2344_p1 }
 0x386   : > { %p2340_p0 = pneg %p2339_p13 }
 0x388   : > { %p2347_p4 = pnand %p2346_p3, %p2340_p0 }
 0x38a   : > { %2350 = shalt.err (!%p2347_p4)
}
 0x38b   : > { %s2351_s23 = scalar_lea.hbm %s3377_s5, 32 }
 0x38c   : > { %p2352_p5 = scmp.ne.s32.totalorder %s3377_s5, %s2351_s23  ;;  %p2357_p8 = scmp.lt.u32.totalorder %s2351_s23, %s3377_s5 }
 0x38e   : > { %p2353_p6 = pnand %p2352_p5, %p3331_p11 }
 0x390   : > { %p2354_p7 = pneg %p2353_p6 }
 0x392   : > { %p2359_p9 = pnand %p2357_p8, %p2354_p7 }
 0x394   : > { %2362 = shalt.err (!%p2359_p9)
}
 0x395   : > { %2229 = dma.vmem_to_hbm [thread:$0]  (%p3331_p11), %s1993_s12, 32, %s3377_s5, [#allocation5]  }
 0x396   : > { %2384 = dma.done.wait (%p3331_p11), [#allocation5], 32  }
 0x397   : > { %2386 = vsyncadd (%p3331_p11), [#allocation5], 4294967264 }
 0x398 PF: > { %s16_s22 = sadd.s32 1, %s2405_s22   ;;  %s3379_s18 = smov %s2393_s19 }
 0x399   : > { %p13_p10 = scmp.ge.s32.totalorder %s16_s22, 4   ;;  %s3380_s19 = smov %s2485_s27 }
 0x39a   : > { %s3381_s20 = smov %s2401_s21  ;;  %s3382_s21 = smov %s3384_s24 }
 0x39b   :  { %15 = sbr.rel (!%p13_p10) target bundleno = 3 (0x3), region = 122 }
 0x3a2   :  { %2005 = vsyncpa [#allocation5], 1 }
 0x3a3   :  { %2007 = vsyncpa [#allocation5 + $0x1], 1 }

</bundles_post_ra>
